<compile_context>
chip_gen: v7x
topology: tpu7x:2x2x1
jax: 0.10.0
libtpu: 0.0.40
codegen_flags: <defaults>
</compile_context>

<pallas_src>
import functools

import jax
import jax.numpy as jnp
from jax.experimental import pallas as pl


# ----------------------------- Pallas kernels ------------------------------

def _qkv_kernel(x_ref, w_ref, b_ref, o_ref):
    # Fused Q|K|V projection: (B*L, D) @ (D, 3D) + (1, 3D)
    o_ref[...] = (jnp.dot(x_ref[...], w_ref[...],
                          preferred_element_type=jnp.float32)
                  + b_ref[...])


def qkv_proj(x2d, w, b):
    M = x2d.shape[0]
    N = w.shape[1]
    return pl.pallas_call(
        _qkv_kernel,
        out_shape=jax.ShapeDtypeStruct((M, N), jnp.float32),
    )(x2d, w, b.reshape(1, N))


def _attn_kernel(q_ref, k_ref, v_ref, o_ref, *maybe_p_ref, inv_scale):
    # All heads processed in a single step.
    # q/k/v: (B*H, L, Dh); scale (the dim_head/2 quirk) folded into q.
    q = q_ref[...] * inv_scale
    s = jnp.einsum("bqd,bkd->bqk", q, k_ref[...],
                   preferred_element_type=jnp.float32)       # (BH, L, L)
    p = jax.nn.softmax(s, axis=-1)
    o_ref[...] = jnp.einsum("bqk,bkd->bqd", p, v_ref[...],
                            preferred_element_type=jnp.float32)
    if maybe_p_ref:                                           # only last block
        maybe_p_ref[0][...] = p


def attn_core(qh, kh, vh, dim_head, emit_p):
    BH, L, Dh = qh.shape
    inv_scale = 2.0 / float(dim_head)       # 1 / (dim_head ** 1 / 2)
    if emit_p:
        out_shape = (jax.ShapeDtypeStruct((BH, L, Dh), jnp.float32),
                     jax.ShapeDtypeStruct((BH, L, L), jnp.float32))
    else:
        out_shape = jax.ShapeDtypeStruct((BH, L, Dh), jnp.float32)
    return pl.pallas_call(
        functools.partial(_attn_kernel, inv_scale=inv_scale),
        out_shape=out_shape,
    )(qh, kh, vh)


def _outproj_lstm_kernel(x_ref, ah_ref, wo_ref, bo_ref,
                         wx_ref, wa_ref, whh_ref, b_ref, o_ref, *, B, L, D):
    # x_ref:  (B*L, D)   block input, rows ordered b*L + t
    # ah_ref: (B*L, D)   attention head outputs (raw-reshaped back), pre out-proj
    # wo_ref: (D, D), bo_ref: (1, D)         output projection
    # wx_ref: (D, 4D)    fused gate weights (i|f|g|o) for the x half of W_ih
    # wa_ref: (D, 4D)    fused gate weights for the attn half of W_ih
    # whh_ref:(D, 4D)    fused recurrent weights
    # b_ref:  (1, 4D)    fused bias (b_ih + b_hh)
    # o_ref:  (B*L, D)   all LSTM hidden states, rows ordered b*L + t
    x = x_ref[...]
    attn = (jnp.dot(ah_ref[...], wo_ref[...],
                    preferred_element_type=jnp.float32) + bo_ref[...])

    # Input-part gate pre-activations for every (b, t) at once: lane-dense 4D.
    gates_in = (jnp.dot(x, wx_ref[...], preferred_element_type=jnp.float32)
                + jnp.dot(attn, wa_ref[...], preferred_element_type=jnp.float32)
                + b_ref[...])                                  # (B*L, 4D)
    whh = whh_ref[...]

    h = jnp.zeros((B, D), jnp.float32)
    c = jnp.zeros((B, D), jnp.float32)
    hs = []
    for t in range(L):                     # fully unrolled, static indices
        g_t = jnp.concatenate(
            [gates_in[b * L + t:b * L + t + 1, :] for b in range(B)], axis=0)
        gates = g_t + jnp.dot(h, whh, preferred_element_type=jnp.float32)
        i = jax.nn.sigmoid(gates[:, 0 * D:1 * D])
        f = jax.nn.sigmoid(gates[:, 1 * D:2 * D])
        g = jnp.tanh(gates[:, 2 * D:3 * D])
        o = jax.nn.sigmoid(gates[:, 3 * D:4 * D])
        c = f * c + i * g
        h = o * jnp.tanh(c)
        hs.append(h)

    # Assemble all hidden states (row order b*L + t) and store once.
    rows = [hs[t][b:b + 1, :] for b in range(B) for t in range(L)]
    o_ref[...] = jnp.concatenate(rows, axis=0)


def outproj_lstm(x2d, ah2d, blk, B, L, D):
    return pl.pallas_call(
        functools.partial(_outproj_lstm_kernel, B=B, L=L, D=D),
        out_shape=jax.ShapeDtypeStruct((B * L, D), jnp.float32),
    )(x2d, ah2d,
      blk["wo"], blk["bo"].reshape(1, D),
      blk["wx"], blk["wa"], blk["whh"], blk["b_lstm"].reshape(1, 4 * D))


# ------------------------------- model glue --------------------------------

def encoder_block(x, blk, num_head, emit_p):
    B, L, D = x.shape
    H = num_head
    Dh = D // H

    x2d = x.reshape(B * L, D)                                  # bitcast
    qkv = qkv_proj(x2d, blk["wqkv"], blk["bqkv"])              # (B*L, 3D)

    # Raw reshape (PyTorch quirk): (B, L, D) -> (B, H, L, Dh) == flat reshape.
    q = qkv[:, 0 * D:1 * D].reshape(B * H, L, Dh)
    k = qkv[:, 1 * D:2 * D].reshape(B * H, L, Dh)
    v = qkv[:, 2 * D:3 * D].reshape(B * H, L, Dh)

    if emit_p:
        attn_h, dist = attn_core(q, k, v, Dh, True)
        self_attn = dist.reshape(B, H, L, L)
    else:
        attn_h = attn_core(q, k, v, Dh, False)
        self_attn = None

    # Raw reshape back: (B, H, L, Dh) -> (B, L, D), kept flat as (B*L, D).
    y2d = outproj_lstm(x2d, attn_h.reshape(B * L, D), blk, B, L, D)
    return y2d.reshape(B, L, D), self_attn


def encoder_forward(token_ids, params, num_head):
    # Embedding gather is glue (plain JAX); Dropout is identity in eval mode.
    out = params["embedding"][token_ids]                       # (B, L, D)
    n_blocks = len(params["blocks"])
    self_attn = None
    for idx, blk in enumerate(params["blocks"]):
        out, sa = encoder_block(out, blk, num_head, emit_p=(idx == n_blocks - 1))
        if sa is not None:
            self_attn = sa
    B, L, D = out.shape
    last_state = out[:, L - 1, :][None, :, :]                  # (1, B, D) == h_n
    return out, last_state, self_attn


# ------------------------------ param init ---------------------------------

def init_params(key, dim_model, num_block, num_head, len_dic):
    D = dim_model
    keys = jax.random.split(key, 1 + num_block)
    params = {
        "embedding": 0.1 * jax.random.normal(keys[0], (len_dic, D), jnp.float32),
        "blocks": [],
    }
    s = 0.1
    for b in range(num_block):
        ks = jax.random.split(keys[1 + b], 8)
        blk = {
            # Fused QKV projection, columns ordered [Wq | Wk | Wv], (in, out).
            "wqkv": s * jax.random.normal(ks[0], (D, 3 * D), jnp.float32),
            "bqkv": s * jax.random.normal(ks[1], (3 * D,), jnp.float32),
            "wo": s * jax.random.normal(ks[2], (D, D), jnp.float32),
            "bo": s * jax.random.normal(ks[3], (D,), jnp.float32),
            # LSTM: gates fused along columns in order (i, f, g, o), weights
            # pre-transposed to (in, out); W_ih split into the x-half (wx) and
            # the attn-half (wa) so concat([x, attn]) is never materialized.
            "wx": s * jax.random.normal(ks[4], (D, 4 * D), jnp.float32),
            "wa": s * jax.random.normal(ks[5], (D, 4 * D), jnp.float32),
            "whh": s * jax.random.normal(ks[6], (D, 4 * D), jnp.float32),
            "b_lstm": s * jax.random.normal(ks[7], (4 * D,), jnp.float32),  # b_ih+b_hh
        }
        params["blocks"].append(blk)
    return params


# --------------------------------- main -------------------------------------

if __name__ == "__main__":
    dim_model, num_block, num_head, len_dic = 32, 2, 4, 20
    B, L = 2, 8

    key = jax.random.PRNGKey(0)
    pkey, xkey = jax.random.split(key)
    params = init_params(pkey, dim_model, num_block, num_head, len_dic)
    token_ids = jax.random.randint(xkey, (B, L), 0, len_dic)

    fwd = jax.jit(functools.partial(encoder_forward, num_head=num_head))
    out, last_state, self_attn = fwd(token_ids, params)
    jax.block_until_ready((out, last_state, self_attn))

    assert out.shape == (B, L, dim_model)
    assert last_state.shape == (1, B, dim_model)
    assert self_attn.shape == (B, num_head, L, L)
    print("KERNEL_OK")
</pallas_src>

<mosaic_0001>
module attributes {stable_mosaic.version = 11 : i64} {
  func.func @_qkv_kernel(%arg0: memref<16x32xf32, #tpu.memory_space<vmem>>, %arg1: memref<32x96xf32, #tpu.memory_space<vmem>>, %arg2: memref<1x96xf32, #tpu.memory_space<vmem>>, %arg3: memref<16x96xf32, #tpu.memory_space<vmem>>) attributes {dimension_semantics = [], scalar_prefetch = 0 : i64, scratch_operands = 0 : i64, tpu.core_type = #tpu.core_type<tc>} {
    %c0 = arith.constant 0 : index
    %c0_0 = arith.constant 0 : index
    %0 = vector.load %arg0[%c0, %c0_0] : memref<16x32xf32, #tpu.memory_space<vmem>>, vector<16x32xf32>
    %c0_1 = arith.constant 0 : index
    %c0_2 = arith.constant 0 : index
    %1 = vector.load %arg1[%c0_1, %c0_2] : memref<32x96xf32, #tpu.memory_space<vmem>>, vector<32x96xf32>
    %cst = arith.constant dense<0.000000e+00> : vector<16x96xf32>
    %2 = tpu.matmul %0, %1, %cst {dimension_numbers = #tpu.dot_dimension_numbers<[1], [0], [0], [1], [0, 0, 1, 1], [], []>} : vector<16x32xf32>, vector<32x96xf32>, vector<16x96xf32> -> vector<16x96xf32>
    %c0_3 = arith.constant 0 : index
    %c0_4 = arith.constant 0 : index
    %3 = vector.load %arg2[%c0_3, %c0_4] : memref<1x96xf32, #tpu.memory_space<vmem>>, vector<1x96xf32>
    %4 = vector.broadcast %3 : vector<1x96xf32> to vector<16x96xf32>
    %5 = arith.addf %2, %4 : vector<16x96xf32>
    %c0_5 = arith.constant 0 : index
    %c0_6 = arith.constant 0 : index
    %6 = vector.load %arg3[%c0_5, %c0_6] : memref<16x96xf32, #tpu.memory_space<vmem>>, vector<16x96xf32>
    tpu.vector_store %arg3[%c0_5, %c0_6], %5 {strides = array<i32>} : memref<16x96xf32, #tpu.memory_space<vmem>>, vector<16x96xf32>,
    return
  }
}

module attributes {stable_mosaic.version = 11 : i64} {
  func.func @_attn_kernel(%arg0: memref<8x8x8xf32, #tpu.memory_space<vmem>>, %arg1: memref<8x8x8xf32, #tpu.memory_space<vmem>>, %arg2: memref<8x8x8xf32, #tpu.memory_space<vmem>>, %arg3: memref<8x8x8xf32, #tpu.memory_space<vmem>>) attributes {dimension_semantics = [], scalar_prefetch = 0 : i64, scratch_operands = 0 : i64, tpu.core_type = #tpu.core_type<tc>} {
    %c0 = arith.constant 0 : index
    %c0_0 = arith.constant 0 : index
    %c0_1 = arith.constant 0 : index
    %0 = vector.load %arg0[%c0, %c0_0, %c0_1] : memref<8x8x8xf32, #tpu.memory_space<vmem>>, vector<8x8x8xf32>
    %cst = arith.constant 2.500000e-01 : f32
    %1 = vector.broadcast %cst : f32 to vector<8x8x8xf32>
    %2 = arith.mulf %0, %1 : vector<8x8x8xf32>
    %c0_2 = arith.constant 0 : index
    %c0_3 = arith.constant 0 : index
    %c0_4 = arith.constant 0 : index
    %3 = vector.load %arg1[%c0_2, %c0_3, %c0_4] : memref<8x8x8xf32, #tpu.memory_space<vmem>>, vector<8x8x8xf32>
    "tpu.trace_start"() <{level = 10 : i32, message = "bqd,bkd->bqk"}> : () -> ()
    %cst_5 = arith.constant dense<0.000000e+00> : vector<8x8x8xf32>
    %4 = tpu.matmul %2, %3, %cst_5 {dimension_numbers = #tpu.dot_dimension_numbers<[2], [2], [1], [1], [0, 0, 0, 1, 1, 1], [0], [0]>} : vector<8x8x8xf32>, vector<8x8x8xf32>, vector<8x8x8xf32> -> vector<8x8x8xf32>
    "tpu.trace_stop"() : () -> ()
    %cst_6 = arith.constant dense<0xFF800000> : vector<8x8xf32>
    %5 = vector.multi_reduction <maximumf>, %4, %cst_6 [2] : vector<8x8x8xf32> to vector<8x8xf32>
    %cst_7 = arith.constant 0xFF800000 : f32
    %6 = vector.broadcast %cst_7 : f32 to vector<8x8xf32>
    %7 = arith.maximumf %6, %5 : vector<8x8xf32>
    %8 = vector.shape_cast %7 : vector<8x8xf32> to vector<8x8x1xf32>
    %9 = vector.broadcast %8 : vector<8x8x1xf32> to vector<8x8x8xf32>
    %10 = arith.subf %4, %9 : vector<8x8x8xf32>
    %11 = math.exp %10 : vector<8x8x8xf32>
    %cst_8 = arith.constant dense<0.000000e+00> : vector<8x8xf32>
    %12 = vector.multi_reduction <add>, %11, %cst_8 [2] : vector<8x8x8xf32> to vector<8x8xf32>
    %13 = vector.shape_cast %12 : vector<8x8xf32> to vector<8x8x1xf32>
    %14 = vector.broadcast %13 : vector<8x8x1xf32> to vector<8x8x8xf32>
    %15 = arith.divf %11, %14 : vector<8x8x8xf32>
    %c0_9 = arith.constant 0 : index
    %c0_10 = arith.constant 0 : index
    %c0_11 = arith.constant 0 : index
    %16 = vector.load %arg2[%c0_9, %c0_10, %c0_11] : memref<8x8x8xf32, #tpu.memory_space<vmem>>, vector<8x8x8xf32>
    "tpu.trace_start"() <{level = 10 : i32, message = "bqk,bkd->bqd"}> : () -> ()
    %cst_12 = arith.constant dense<0.000000e+00> : vector<8x8x8xf32>
    %17 = tpu.matmul %15, %16, %cst_12 {dimension_numbers = #tpu.dot_dimension_numbers<[2], [1], [1], [2], [0, 0, 0, 1, 1, 2], [0], [0]>} : vector<8x8x8xf32>, vector<8x8x8xf32>, vector<8x8x8xf32> -> vector<8x8x8xf32>
    "tpu.trace_stop"() : () -> ()
    %c0_13 = arith.constant 0 : index
    %c0_14 = arith.constant 0 : index
    %c0_15 = arith.constant 0 : index
    %18 = vector.load %arg3[%c0_13, %c0_14, %c0_15] : memref<8x8x8xf32, #tpu.memory_space<vmem>>, vector<8x8x8xf32>
    tpu.vector_store %arg3[%c0_13, %c0_14, %c0_15], %17 {strides = array<i32>} : memref<8x8x8xf32, #tpu.memory_space<vmem>>, vector<8x8x8xf32>,
    return
  }
}

module attributes {stable_mosaic.version = 11 : i64} {
  func.func @_attn_kernel(%arg0: memref<8x8x8xf32, #tpu.memory_space<vmem>>, %arg1: memref<8x8x8xf32, #tpu.memory_space<vmem>>, %arg2: memref<8x8x8xf32, #tpu.memory_space<vmem>>, %arg3: memref<8x8x8xf32, #tpu.memory_space<vmem>>, %arg4: memref<8x8x8xf32, #tpu.memory_space<vmem>>) attributes {dimension_semantics = [], scalar_prefetch = 0 : i64, scratch_operands = 0 : i64, tpu.core_type = #tpu.core_type<tc>} {
    %c0 = arith.constant 0 : index
    %c0_0 = arith.constant 0 : index
    %c0_1 = arith.constant 0 : index
    %0 = vector.load %arg0[%c0, %c0_0, %c0_1] : memref<8x8x8xf32, #tpu.memory_space<vmem>>, vector<8x8x8xf32>
    %cst = arith.constant 2.500000e-01 : f32
    %1 = vector.broadcast %cst : f32 to vector<8x8x8xf32>
    %2 = arith.mulf %0, %1 : vector<8x8x8xf32>
    %c0_2 = arith.constant 0 : index
    %c0_3 = arith.constant 0 : index
    %c0_4 = arith.constant 0 : index
    %3 = vector.load %arg1[%c0_2, %c0_3, %c0_4] : memref<8x8x8xf32, #tpu.memory_space<vmem>>, vector<8x8x8xf32>
    "tpu.trace_start"() <{level = 10 : i32, message = "bqd,bkd->bqk"}> : () -> ()
    %cst_5 = arith.constant dense<0.000000e+00> : vector<8x8x8xf32>
    %4 = tpu.matmul %2, %3, %cst_5 {dimension_numbers = #tpu.dot_dimension_numbers<[2], [2], [1], [1], [0, 0, 0, 1, 1, 1], [0], [0]>} : vector<8x8x8xf32>, vector<8x8x8xf32>, vector<8x8x8xf32> -> vector<8x8x8xf32>
    "tpu.trace_stop"() : () -> ()
    %cst_6 = arith.constant dense<0xFF800000> : vector<8x8xf32>
    %5 = vector.multi_reduction <maximumf>, %4, %cst_6 [2] : vector<8x8x8xf32> to vector<8x8xf32>
    %cst_7 = arith.constant 0xFF800000 : f32
    %6 = vector.broadcast %cst_7 : f32 to vector<8x8xf32>
    %7 = arith.maximumf %6, %5 : vector<8x8xf32>
    %8 = vector.shape_cast %7 : vector<8x8xf32> to vector<8x8x1xf32>
    %9 = vector.broadcast %8 : vector<8x8x1xf32> to vector<8x8x8xf32>
    %10 = arith.subf %4, %9 : vector<8x8x8xf32>
    %11 = math.exp %10 : vector<8x8x8xf32>
    %cst_8 = arith.constant dense<0.000000e+00> : vector<8x8xf32>
    %12 = vector.multi_reduction <add>, %11, %cst_8 [2] : vector<8x8x8xf32> to vector<8x8xf32>
    %13 = vector.shape_cast %12 : vector<8x8xf32> to vector<8x8x1xf32>
    %14 = vector.broadcast %13 : vector<8x8x1xf32> to vector<8x8x8xf32>
    %15 = arith.divf %11, %14 : vector<8x8x8xf32>
    %c0_9 = arith.constant 0 : index
    %c0_10 = arith.constant 0 : index
    %c0_11 = arith.constant 0 : index
    %16 = vector.load %arg2[%c0_9, %c0_10, %c0_11] : memref<8x8x8xf32, #tpu.memory_space<vmem>>, vector<8x8x8xf32>
    "tpu.trace_start"() <{level = 10 : i32, message = "bqk,bkd->bqd"}> : () -> ()
    %cst_12 = arith.constant dense<0.000000e+00> : vector<8x8x8xf32>
    %17 = tpu.matmul %15, %16, %cst_12 {dimension_numbers = #tpu.dot_dimension_numbers<[2], [1], [1], [2], [0, 0, 0, 1, 1, 2], [0], [0]>} : vector<8x8x8xf32>, vector<8x8x8xf32>, vector<8x8x8xf32> -> vector<8x8x8xf32>
    "tpu.trace_stop"() : () -> ()
    %c0_13 = arith.constant 0 : index
    %c0_14 = arith.constant 0 : index
    %c0_15 = arith.constant 0 : index
    %18 = vector.load %arg3[%c0_13, %c0_14, %c0_15] : memref<8x8x8xf32, #tpu.memory_space<vmem>>, vector<8x8x8xf32>
    tpu.vector_store %arg3[%c0_13, %c0_14, %c0_15], %17 {strides = array<i32>} : memref<8x8x8xf32, #tpu.memory_space<vmem>>, vector<8x8x8xf32>,
    %c0_16 = arith.constant 0 : index
    %c0_17 = arith.constant 0 : index
    %c0_18 = arith.constant 0 : index
    %19 = vector.load %arg4[%c0_16, %c0_17, %c0_18] : memref<8x8x8xf32, #tpu.memory_space<vmem>>, vector<8x8x8xf32>
    tpu.vector_store %arg4[%c0_16, %c0_17, %c0_18], %15 {strides = array<i32>} : memref<8x8x8xf32, #tpu.memory_space<vmem>>, vector<8x8x8xf32>,
    return
  }
}

module attributes {stable_mosaic.version = 11 : i64} {
  func.func @_outproj_lstm_kernel(%arg0: memref<16x32xf32, #tpu.memory_space<vmem>>, %arg1: memref<16x32xf32, #tpu.memory_space<vmem>>, %arg2: memref<32x32xf32, #tpu.memory_space<vmem>>, %arg3: memref<1x32xf32, #tpu.memory_space<vmem>>, %arg4: memref<32x128xf32, #tpu.memory_space<vmem>>, %arg5: memref<32x128xf32, #tpu.memory_space<vmem>>, %arg6: memref<32x128xf32, #tpu.memory_space<vmem>>, %arg7: memref<1x128xf32, #tpu.memory_space<vmem>>, %arg8: memref<16x32xf32, #tpu.memory_space<vmem>>) attributes {dimension_semantics = [], scalar_prefetch = 0 : i64, scratch_operands = 0 : i64, tpu.core_type = #tpu.core_type<tc>} {
    %c0 = arith.constant 0 : index
    %c0_0 = arith.constant 0 : index
    %0 = vector.load %arg0[%c0, %c0_0] : memref<16x32xf32, #tpu.memory_space<vmem>>, vector<16x32xf32>
    %c0_1 = arith.constant 0 : index
    %c0_2 = arith.constant 0 : index
    %1 = vector.load %arg1[%c0_1, %c0_2] : memref<16x32xf32, #tpu.memory_space<vmem>>, vector<16x32xf32>
    %c0_3 = arith.constant 0 : index
    %c0_4 = arith.constant 0 : index
    %2 = vector.load %arg2[%c0_3, %c0_4] : memref<32x32xf32, #tpu.memory_space<vmem>>, vector<32x32xf32>
    %cst = arith.constant dense<0.000000e+00> : vector<16x32xf32>
    %3 = tpu.matmul %1, %2, %cst {dimension_numbers = #tpu.dot_dimension_numbers<[1], [0], [0], [1], [0, 0, 1, 1], [], []>} : vector<16x32xf32>, vector<32x32xf32>, vector<16x32xf32> -> vector<16x32xf32>
    %c0_5 = arith.constant 0 : index
    %c0_6 = arith.constant 0 : index
    %4 = vector.load %arg3[%c0_5, %c0_6] : memref<1x32xf32, #tpu.memory_space<vmem>>, vector<1x32xf32>
    %5 = vector.broadcast %4 : vector<1x32xf32> to vector<16x32xf32>
    %6 = arith.addf %3, %5 : vector<16x32xf32>
    %c0_7 = arith.constant 0 : index
    %c0_8 = arith.constant 0 : index
    %7 = vector.load %arg4[%c0_7, %c0_8] : memref<32x128xf32, #tpu.memory_space<vmem>>, vector<32x128xf32>
    %cst_9 = arith.constant dense<0.000000e+00> : vector<16x128xf32>
    %8 = tpu.matmul %0, %7, %cst_9 {dimension_numbers = #tpu.dot_dimension_numbers<[1], [0], [0], [1], [0, 0, 1, 1], [], []>} : vector<16x32xf32>, vector<32x128xf32>, vector<16x128xf32> -> vector<16x128xf32>
    %c0_10 = arith.constant 0 : index
    %c0_11 = arith.constant 0 : index
    %9 = vector.load %arg5[%c0_10, %c0_11] : memref<32x128xf32, #tpu.memory_space<vmem>>, vector<32x128xf32>
    %cst_12 = arith.constant dense<0.000000e+00> : vector<16x128xf32>
    %10 = tpu.matmul %6, %9, %cst_12 {dimension_numbers = #tpu.dot_dimension_numbers<[1], [0], [0], [1], [0, 0, 1, 1], [], []>} : vector<16x32xf32>, vector<32x128xf32>, vector<16x128xf32> -> vector<16x128xf32>
    %11 = arith.addf %8, %10 : vector<16x128xf32>
    %c0_13 = arith.constant 0 : index
    %c0_14 = arith.constant 0 : index
    %12 = vector.load %arg7[%c0_13, %c0_14] : memref<1x128xf32, #tpu.memory_space<vmem>>, vector<1x128xf32>
    %13 = vector.broadcast %12 : vector<1x128xf32> to vector<16x128xf32>
    %14 = arith.addf %11, %13 : vector<16x128xf32>
    %c0_15 = arith.constant 0 : index
    %c0_16 = arith.constant 0 : index
    %15 = vector.load %arg6[%c0_15, %c0_16] : memref<32x128xf32, #tpu.memory_space<vmem>>, vector<32x128xf32>
    %cst_17 = arith.constant 0.000000e+00 : f32
    %16 = vector.broadcast %cst_17 : f32 to vector<2x32xf32>
    %cst_18 = arith.constant 0.000000e+00 : f32
    %17 = vector.broadcast %cst_18 : f32 to vector<2x32xf32>
    %18 = vector.extract_strided_slice %14 {offsets = [0, 0], sizes = [1, 128], strides = [1, 1]} : vector<16x128xf32> to vector<1x128xf32>
    %19 = vector.extract_strided_slice %14 {offsets = [8, 0], sizes = [1, 128], strides = [1, 1]} : vector<16x128xf32> to vector<1x128xf32>
    %20 = tpu.concatenate %18, %19 in 0 : vector<1x128xf32>, vector<1x128xf32> -> vector<2x128xf32>
    %cst_19 = arith.constant dense<0.000000e+00> : vector<2x128xf32>
    %21 = tpu.matmul %16, %15, %cst_19 {dimension_numbers = #tpu.dot_dimension_numbers<[1], [0], [0], [1], [0, 0, 1, 1], [], []>} : vector<2x32xf32>, vector<32x128xf32>, vector<2x128xf32> -> vector<2x128xf32>
    %22 = arith.addf %20, %21 : vector<2x128xf32>
    %23 = vector.extract_strided_slice %22 {offsets = [0, 0], sizes = [2, 32], strides = [1, 1]} : vector<2x128xf32> to vector<2x32xf32>
    %24 = arith.negf %23 : vector<2x32xf32>
    %25 = math.exp %24 : vector<2x32xf32>
    %cst_20 = arith.constant 1.000000e+00 : f32
    %26 = vector.broadcast %cst_20 : f32 to vector<2x32xf32>
    %27 = arith.addf %26, %25 : vector<2x32xf32>
    %28 = arith.divf %26, %27 : vector<2x32xf32>
    %29 = vector.extract_strided_slice %22 {offsets = [0, 32], sizes = [2, 32], strides = [1, 1]} : vector<2x128xf32> to vector<2x32xf32>
    %30 = arith.negf %29 : vector<2x32xf32>
    %31 = math.exp %30 : vector<2x32xf32>
    %cst_21 = arith.constant 1.000000e+00 : f32
    %32 = vector.broadcast %cst_21 : f32 to vector<2x32xf32>
    %33 = arith.addf %32, %31 : vector<2x32xf32>
    %34 = arith.divf %32, %33 : vector<2x32xf32>
    %35 = vector.extract_strided_slice %22 {offsets = [0, 64], sizes = [2, 32], strides = [1, 1]} : vector<2x128xf32> to vector<2x32xf32>
    %36 = math.tanh %35 : vector<2x32xf32>
    %37 = vector.extract_strided_slice %22 {offsets = [0, 96], sizes = [2, 32], strides = [1, 1]} : vector<2x128xf32> to vector<2x32xf32>
    %38 = arith.negf %37 : vector<2x32xf32>
    %39 = math.exp %38 : vector<2x32xf32>
    %cst_22 = arith.constant 1.000000e+00 : f32
    %40 = vector.broadcast %cst_22 : f32 to vector<2x32xf32>
    %41 = arith.addf %40, %39 : vector<2x32xf32>
    %42 = arith.divf %40, %41 : vector<2x32xf32>
    %43 = arith.mulf %34, %17 : vector<2x32xf32>
    %44 = arith.mulf %28, %36 : vector<2x32xf32>
    %45 = arith.addf %43, %44 : vector<2x32xf32>
    %46 = math.tanh %45 : vector<2x32xf32>
    %47 = arith.mulf %42, %46 : vector<2x32xf32>
    %48 = vector.extract_strided_slice %14 {offsets = [1, 0], sizes = [1, 128], strides = [1, 1]} : vector<16x128xf32> to vector<1x128xf32>
    %49 = vector.extract_strided_slice %14 {offsets = [9, 0], sizes = [1, 128], strides = [1, 1]} : vector<16x128xf32> to vector<1x128xf32>
    %50 = tpu.concatenate %48, %49 in 0 : vector<1x128xf32>, vector<1x128xf32> -> vector<2x128xf32>
    %cst_23 = arith.constant dense<0.000000e+00> : vector<2x128xf32>
    %51 = tpu.matmul %47, %15, %cst_23 {dimension_numbers = #tpu.dot_dimension_numbers<[1], [0], [0], [1], [0, 0, 1, 1], [], []>} : vector<2x32xf32>, vector<32x128xf32>, vector<2x128xf32> -> vector<2x128xf32>
    %52 = arith.addf %50, %51 : vector<2x128xf32>
    %53 = vector.extract_strided_slice %52 {offsets = [0, 0], sizes = [2, 32], strides = [1, 1]} : vector<2x128xf32> to vector<2x32xf32>
    %54 = arith.negf %53 : vector<2x32xf32>
    %55 = math.exp %54 : vector<2x32xf32>
    %cst_24 = arith.constant 1.000000e+00 : f32
    %56 = vector.broadcast %cst_24 : f32 to vector<2x32xf32>
    %57 = arith.addf %56, %55 : vector<2x32xf32>
    %58 = arith.divf %56, %57 : vector<2x32xf32>
    %59 = vector.extract_strided_slice %52 {offsets = [0, 32], sizes = [2, 32], strides = [1, 1]} : vector<2x128xf32> to vector<2x32xf32>
    %60 = arith.negf %59 : vector<2x32xf32>
    %61 = math.exp %60 : vector<2x32xf32>
    %cst_25 = arith.constant 1.000000e+00 : f32
    %62 = vector.broadcast %cst_25 : f32 to vector<2x32xf32>
    %63 = arith.addf %62, %61 : vector<2x32xf32>
    %64 = arith.divf %62, %63 : vector<2x32xf32>
    %65 = vector.extract_strided_slice %52 {offsets = [0, 64], sizes = [2, 32], strides = [1, 1]} : vector<2x128xf32> to vector<2x32xf32>
    %66 = math.tanh %65 : vector<2x32xf32>
    %67 = vector.extract_strided_slice %52 {offsets = [0, 96], sizes = [2, 32], strides = [1, 1]} : vector<2x128xf32> to vector<2x32xf32>
    %68 = arith.negf %67 : vector<2x32xf32>
    %69 = math.exp %68 : vector<2x32xf32>
    %cst_26 = arith.constant 1.000000e+00 : f32
    %70 = vector.broadcast %cst_26 : f32 to vector<2x32xf32>
    %71 = arith.addf %70, %69 : vector<2x32xf32>
    %72 = arith.divf %70, %71 : vector<2x32xf32>
    %73 = arith.mulf %64, %45 : vector<2x32xf32>
    %74 = arith.mulf %58, %66 : vector<2x32xf32>
    %75 = arith.addf %73, %74 : vector<2x32xf32>
    %76 = math.tanh %75 : vector<2x32xf32>
    %77 = arith.mulf %72, %76 : vector<2x32xf32>
    %78 = vector.extract_strided_slice %14 {offsets = [2, 0], sizes = [1, 128], strides = [1, 1]} : vector<16x128xf32> to vector<1x128xf32>
    %79 = vector.extract_strided_slice %14 {offsets = [10, 0], sizes = [1, 128], strides = [1, 1]} : vector<16x128xf32> to vector<1x128xf32>
    %80 = tpu.concatenate %78, %79 in 0 : vector<1x128xf32>, vector<1x128xf32> -> vector<2x128xf32>
    %cst_27 = arith.constant dense<0.000000e+00> : vector<2x128xf32>
    %81 = tpu.matmul %77, %15, %cst_27 {dimension_numbers = #tpu.dot_dimension_numbers<[1], [0], [0], [1], [0, 0, 1, 1], [], []>} : vector<2x32xf32>, vector<32x128xf32>, vector<2x128xf32> -> vector<2x128xf32>
    %82 = arith.addf %80, %81 : vector<2x128xf32>
    %83 = vector.extract_strided_slice %82 {offsets = [0, 0], sizes = [2, 32], strides = [1, 1]} : vector<2x128xf32> to vector<2x32xf32>
    %84 = arith.negf %83 : vector<2x32xf32>
    %85 = math.exp %84 : vector<2x32xf32>
    %cst_28 = arith.constant 1.000000e+00 : f32
    %86 = vector.broadcast %cst_28 : f32 to vector<2x32xf32>
    %87 = arith.addf %86, %85 : vector<2x32xf32>
    %88 = arith.divf %86, %87 : vector<2x32xf32>
    %89 = vector.extract_strided_slice %82 {offsets = [0, 32], sizes = [2, 32], strides = [1, 1]} : vector<2x128xf32> to vector<2x32xf32>
    %90 = arith.negf %89 : vector<2x32xf32>
    %91 = math.exp %90 : vector<2x32xf32>
    %cst_29 = arith.constant 1.000000e+00 : f32
    %92 = vector.broadcast %cst_29 : f32 to vector<2x32xf32>
    %93 = arith.addf %92, %91 : vector<2x32xf32>
    %94 = arith.divf %92, %93 : vector<2x32xf32>
    %95 = vector.extract_strided_slice %82 {offsets = [0, 64], sizes = [2, 32], strides = [1, 1]} : vector<2x128xf32> to vector<2x32xf32>
    %96 = math.tanh %95 : vector<2x32xf32>
    %97 = vector.extract_strided_slice %82 {offsets = [0, 96], sizes = [2, 32], strides = [1, 1]} : vector<2x128xf32> to vector<2x32xf32>
    %98 = arith.negf %97 : vector<2x32xf32>
    %99 = math.exp %98 : vector<2x32xf32>
    %cst_30 = arith.constant 1.000000e+00 : f32
    %100 = vector.broadcast %cst_30 : f32 to vector<2x32xf32>
    %101 = arith.addf %100, %99 : vector<2x32xf32>
    %102 = arith.divf %100, %101 : vector<2x32xf32>
    %103 = arith.mulf %94, %75 : vector<2x32xf32>
    %104 = arith.mulf %88, %96 : vector<2x32xf32>
    %105 = arith.addf %103, %104 : vector<2x32xf32>
    %106 = math.tanh %105 : vector<2x32xf32>
    %107 = arith.mulf %102, %106 : vector<2x32xf32>
    %108 = vector.extract_strided_slice %14 {offsets = [3, 0], sizes = [1, 128], strides = [1, 1]} : vector<16x128xf32> to vector<1x128xf32>
    %109 = vector.extract_strided_slice %14 {offsets = [11, 0], sizes = [1, 128], strides = [1, 1]} : vector<16x128xf32> to vector<1x128xf32>
    %110 = tpu.concatenate %108, %109 in 0 : vector<1x128xf32>, vector<1x128xf32> -> vector<2x128xf32>
    %cst_31 = arith.constant dense<0.000000e+00> : vector<2x128xf32>
    %111 = tpu.matmul %107, %15, %cst_31 {dimension_numbers = #tpu.dot_dimension_numbers<[1], [0], [0], [1], [0, 0, 1, 1], [], []>} : vector<2x32xf32>, vector<32x128xf32>, vector<2x128xf32> -> vector<2x128xf32>
    %112 = arith.addf %110, %111 : vector<2x128xf32>
    %113 = vector.extract_strided_slice %112 {offsets = [0, 0], sizes = [2, 32], strides = [1, 1]} : vector<2x128xf32> to vector<2x32xf32>
    %114 = arith.negf %113 : vector<2x32xf32>
    %115 = math.exp %114 : vector<2x32xf32>
    %cst_32 = arith.constant 1.000000e+00 : f32
    %116 = vector.broadcast %cst_32 : f32 to vector<2x32xf32>
    %117 = arith.addf %116, %115 : vector<2x32xf32>
    %118 = arith.divf %116, %117 : vector<2x32xf32>
    %119 = vector.extract_strided_slice %112 {offsets = [0, 32], sizes = [2, 32], strides = [1, 1]} : vector<2x128xf32> to vector<2x32xf32>
    %120 = arith.negf %119 : vector<2x32xf32>
    %121 = math.exp %120 : vector<2x32xf32>
    %cst_33 = arith.constant 1.000000e+00 : f32
    %122 = vector.broadcast %cst_33 : f32 to vector<2x32xf32>
    %123 = arith.addf %122, %121 : vector<2x32xf32>
    %124 = arith.divf %122, %123 : vector<2x32xf32>
    %125 = vector.extract_strided_slice %112 {offsets = [0, 64], sizes = [2, 32], strides = [1, 1]} : vector<2x128xf32> to vector<2x32xf32>
    %126 = math.tanh %125 : vector<2x32xf32>
    %127 = vector.extract_strided_slice %112 {offsets = [0, 96], sizes = [2, 32], strides = [1, 1]} : vector<2x128xf32> to vector<2x32xf32>
    %128 = arith.negf %127 : vector<2x32xf32>
    %129 = math.exp %128 : vector<2x32xf32>
    %cst_34 = arith.constant 1.000000e+00 : f32
    %130 = vector.broadcast %cst_34 : f32 to vector<2x32xf32>
    %131 = arith.addf %130, %129 : vector<2x32xf32>
    %132 = arith.divf %130, %131 : vector<2x32xf32>
    %133 = arith.mulf %124, %105 : vector<2x32xf32>
    %134 = arith.mulf %118, %126 : vector<2x32xf32>
    %135 = arith.addf %133, %134 : vector<2x32xf32>
    %136 = math.tanh %135 : vector<2x32xf32>
    %137 = arith.mulf %132, %136 : vector<2x32xf32>
    %138 = vector.extract_strided_slice %14 {offsets = [4, 0], sizes = [1, 128], strides = [1, 1]} : vector<16x128xf32> to vector<1x128xf32>
    %139 = vector.extract_strided_slice %14 {offsets = [12, 0], sizes = [1, 128], strides = [1, 1]} : vector<16x128xf32> to vector<1x128xf32>
    %140 = tpu.concatenate %138, %139 in 0 : vector<1x128xf32>, vector<1x128xf32> -> vector<2x128xf32>
    %cst_35 = arith.constant dense<0.000000e+00> : vector<2x128xf32>
    %141 = tpu.matmul %137, %15, %cst_35 {dimension_numbers = #tpu.dot_dimension_numbers<[1], [0], [0], [1], [0, 0, 1, 1], [], []>} : vector<2x32xf32>, vector<32x128xf32>, vector<2x128xf32> -> vector<2x128xf32>
    %142 = arith.addf %140, %141 : vector<2x128xf32>
    %143 = vector.extract_strided_slice %142 {offsets = [0, 0], sizes = [2, 32], strides = [1, 1]} : vector<2x128xf32> to vector<2x32xf32>
    %144 = arith.negf %143 : vector<2x32xf32>
    %145 = math.exp %144 : vector<2x32xf32>
    %cst_36 = arith.constant 1.000000e+00 : f32
    %146 = vector.broadcast %cst_36 : f32 to vector<2x32xf32>
    %147 = arith.addf %146, %145 : vector<2x32xf32>
    %148 = arith.divf %146, %147 : vector<2x32xf32>
    %149 = vector.extract_strided_slice %142 {offsets = [0, 32], sizes = [2, 32], strides = [1, 1]} : vector<2x128xf32> to vector<2x32xf32>
    %150 = arith.negf %149 : vector<2x32xf32>
    %151 = math.exp %150 : vector<2x32xf32>
    %cst_37 = arith.constant 1.000000e+00 : f32
    %152 = vector.broadcast %cst_37 : f32 to vector<2x32xf32>
    %153 = arith.addf %152, %151 : vector<2x32xf32>
    %154 = arith.divf %152, %153 : vector<2x32xf32>
    %155 = vector.extract_strided_slice %142 {offsets = [0, 64], sizes = [2, 32], strides = [1, 1]} : vector<2x128xf32> to vector<2x32xf32>
    %156 = math.tanh %155 : vector<2x32xf32>
    %157 = vector.extract_strided_slice %142 {offsets = [0, 96], sizes = [2, 32], strides = [1, 1]} : vector<2x128xf32> to vector<2x32xf32>
    %158 = arith.negf %157 : vector<2x32xf32>
    %159 = math.exp %158 : vector<2x32xf32>
    %cst_38 = arith.constant 1.000000e+00 : f32
    %160 = vector.broadcast %cst_38 : f32 to vector<2x32xf32>
    %161 = arith.addf %160, %159 : vector<2x32xf32>
    %162 = arith.divf %160, %161 : vector<2x32xf32>
    %163 = arith.mulf %154, %135 : vector<2x32xf32>
    %164 = arith.mulf %148, %156 : vector<2x32xf32>
    %165 = arith.addf %163, %164 : vector<2x32xf32>
    %166 = math.tanh %165 : vector<2x32xf32>
    %167 = arith.mulf %162, %166 : vector<2x32xf32>
    %168 = vector.extract_strided_slice %14 {offsets = [5, 0], sizes = [1, 128], strides = [1, 1]} : vector<16x128xf32> to vector<1x128xf32>
    %169 = vector.extract_strided_slice %14 {offsets = [13, 0], sizes = [1, 128], strides = [1, 1]} : vector<16x128xf32> to vector<1x128xf32>
    %170 = tpu.concatenate %168, %169 in 0 : vector<1x128xf32>, vector<1x128xf32> -> vector<2x128xf32>
    %cst_39 = arith.constant dense<0.000000e+00> : vector<2x128xf32>
    %171 = tpu.matmul %167, %15, %cst_39 {dimension_numbers = #tpu.dot_dimension_numbers<[1], [0], [0], [1], [0, 0, 1, 1], [], []>} : vector<2x32xf32>, vector<32x128xf32>, vector<2x128xf32> -> vector<2x128xf32>
    %172 = arith.addf %170, %171 : vector<2x128xf32>
    %173 = vector.extract_strided_slice %172 {offsets = [0, 0], sizes = [2, 32], strides = [1, 1]} : vector<2x128xf32> to vector<2x32xf32>
    %174 = arith.negf %173 : vector<2x32xf32>
    %175 = math.exp %174 : vector<2x32xf32>
    %cst_40 = arith.constant 1.000000e+00 : f32
    %176 = vector.broadcast %cst_40 : f32 to vector<2x32xf32>
    %177 = arith.addf %176, %175 : vector<2x32xf32>
    %178 = arith.divf %176, %177 : vector<2x32xf32>
    %179 = vector.extract_strided_slice %172 {offsets = [0, 32], sizes = [2, 32], strides = [1, 1]} : vector<2x128xf32> to vector<2x32xf32>
    %180 = arith.negf %179 : vector<2x32xf32>
    %181 = math.exp %180 : vector<2x32xf32>
    %cst_41 = arith.constant 1.000000e+00 : f32
    %182 = vector.broadcast %cst_41 : f32 to vector<2x32xf32>
    %183 = arith.addf %182, %181 : vector<2x32xf32>
    %184 = arith.divf %182, %183 : vector<2x32xf32>
    %185 = vector.extract_strided_slice %172 {offsets = [0, 64], sizes = [2, 32], strides = [1, 1]} : vector<2x128xf32> to vector<2x32xf32>
    %186 = math.tanh %185 : vector<2x32xf32>
    %187 = vector.extract_strided_slice %172 {offsets = [0, 96], sizes = [2, 32], strides = [1, 1]} : vector<2x128xf32> to vector<2x32xf32>
    %188 = arith.negf %187 : vector<2x32xf32>
    %189 = math.exp %188 : vector<2x32xf32>
    %cst_42 = arith.constant 1.000000e+00 : f32
    %190 = vector.broadcast %cst_42 : f32 to vector<2x32xf32>
    %191 = arith.addf %190, %189 : vector<2x32xf32>
    %192 = arith.divf %190, %191 : vector<2x32xf32>
    %193 = arith.mulf %184, %165 : vector<2x32xf32>
    %194 = arith.mulf %178, %186 : vector<2x32xf32>
    %195 = arith.addf %193, %194 : vector<2x32xf32>
    %196 = math.tanh %195 : vector<2x32xf32>
    %197 = arith.mulf %192, %196 : vector<2x32xf32>
    %198 = vector.extract_strided_slice %14 {offsets = [6, 0], sizes = [1, 128], strides = [1, 1]} : vector<16x128xf32> to vector<1x128xf32>
    %199 = vector.extract_strided_slice %14 {offsets = [14, 0], sizes = [1, 128], strides = [1, 1]} : vector<16x128xf32> to vector<1x128xf32>
    %200 = tpu.concatenate %198, %199 in 0 : vector<1x128xf32>, vector<1x128xf32> -> vector<2x128xf32>
    %cst_43 = arith.constant dense<0.000000e+00> : vector<2x128xf32>
    %201 = tpu.matmul %197, %15, %cst_43 {dimension_numbers = #tpu.dot_dimension_numbers<[1], [0], [0], [1], [0, 0, 1, 1], [], []>} : vector<2x32xf32>, vector<32x128xf32>, vector<2x128xf32> -> vector<2x128xf32>
    %202 = arith.addf %200, %201 : vector<2x128xf32>
    %203 = vector.extract_strided_slice %202 {offsets = [0, 0], sizes = [2, 32], strides = [1, 1]} : vector<2x128xf32> to vector<2x32xf32>
    %204 = arith.negf %203 : vector<2x32xf32>
    %205 = math.exp %204 : vector<2x32xf32>
    %cst_44 = arith.constant 1.000000e+00 : f32
    %206 = vector.broadcast %cst_44 : f32 to vector<2x32xf32>
    %207 = arith.addf %206, %205 : vector<2x32xf32>
    %208 = arith.divf %206, %207 : vector<2x32xf32>
    %209 = vector.extract_strided_slice %202 {offsets = [0, 32], sizes = [2, 32], strides = [1, 1]} : vector<2x128xf32> to vector<2x32xf32>
    %210 = arith.negf %209 : vector<2x32xf32>
    %211 = math.exp %210 : vector<2x32xf32>
    %cst_45 = arith.constant 1.000000e+00 : f32
    %212 = vector.broadcast %cst_45 : f32 to vector<2x32xf32>
    %213 = arith.addf %212, %211 : vector<2x32xf32>
    %214 = arith.divf %212, %213 : vector<2x32xf32>
    %215 = vector.extract_strided_slice %202 {offsets = [0, 64], sizes = [2, 32], strides = [1, 1]} : vector<2x128xf32> to vector<2x32xf32>
    %216 = math.tanh %215 : vector<2x32xf32>
    %217 = vector.extract_strided_slice %202 {offsets = [0, 96], sizes = [2, 32], strides = [1, 1]} : vector<2x128xf32> to vector<2x32xf32>
    %218 = arith.negf %217 : vector<2x32xf32>
    %219 = math.exp %218 : vector<2x32xf32>
    %cst_46 = arith.constant 1.000000e+00 : f32
    %220 = vector.broadcast %cst_46 : f32 to vector<2x32xf32>
    %221 = arith.addf %220, %219 : vector<2x32xf32>
    %222 = arith.divf %220, %221 : vector<2x32xf32>
    %223 = arith.mulf %214, %195 : vector<2x32xf32>
    %224 = arith.mulf %208, %216 : vector<2x32xf32>
    %225 = arith.addf %223, %224 : vector<2x32xf32>
    %226 = math.tanh %225 : vector<2x32xf32>
    %227 = arith.mulf %222, %226 : vector<2x32xf32>
    %228 = vector.extract_strided_slice %14 {offsets = [7, 0], sizes = [1, 128], strides = [1, 1]} : vector<16x128xf32> to vector<1x128xf32>
    %229 = vector.extract_strided_slice %14 {offsets = [15, 0], sizes = [1, 128], strides = [1, 1]} : vector<16x128xf32> to vector<1x128xf32>
    %230 = tpu.concatenate %228, %229 in 0 : vector<1x128xf32>, vector<1x128xf32> -> vector<2x128xf32>
    %cst_47 = arith.constant dense<0.000000e+00> : vector<2x128xf32>
    %231 = tpu.matmul %227, %15, %cst_47 {dimension_numbers = #tpu.dot_dimension_numbers<[1], [0], [0], [1], [0, 0, 1, 1], [], []>} : vector<2x32xf32>, vector<32x128xf32>, vector<2x128xf32> -> vector<2x128xf32>
    %232 = arith.addf %230, %231 : vector<2x128xf32>
    %233 = vector.extract_strided_slice %232 {offsets = [0, 0], sizes = [2, 32], strides = [1, 1]} : vector<2x128xf32> to vector<2x32xf32>
    %234 = arith.negf %233 : vector<2x32xf32>
    %235 = math.exp %234 : vector<2x32xf32>
    %cst_48 = arith.constant 1.000000e+00 : f32
    %236 = vector.broadcast %cst_48 : f32 to vector<2x32xf32>
    %237 = arith.addf %236, %235 : vector<2x32xf32>
    %238 = arith.divf %236, %237 : vector<2x32xf32>
    %239 = vector.extract_strided_slice %232 {offsets = [0, 32], sizes = [2, 32], strides = [1, 1]} : vector<2x128xf32> to vector<2x32xf32>
    %240 = arith.negf %239 : vector<2x32xf32>
    %241 = math.exp %240 : vector<2x32xf32>
    %cst_49 = arith.constant 1.000000e+00 : f32
    %242 = vector.broadcast %cst_49 : f32 to vector<2x32xf32>
    %243 = arith.addf %242, %241 : vector<2x32xf32>
    %244 = arith.divf %242, %243 : vector<2x32xf32>
    %245 = vector.extract_strided_slice %232 {offsets = [0, 64], sizes = [2, 32], strides = [1, 1]} : vector<2x128xf32> to vector<2x32xf32>
    %246 = math.tanh %245 : vector<2x32xf32>
    %247 = vector.extract_strided_slice %232 {offsets = [0, 96], sizes = [2, 32], strides = [1, 1]} : vector<2x128xf32> to vector<2x32xf32>
    %248 = arith.negf %247 : vector<2x32xf32>
    %249 = math.exp %248 : vector<2x32xf32>
    %cst_50 = arith.constant 1.000000e+00 : f32
    %250 = vector.broadcast %cst_50 : f32 to vector<2x32xf32>
    %251 = arith.addf %250, %249 : vector<2x32xf32>
    %252 = arith.divf %250, %251 : vector<2x32xf32>
    %253 = arith.mulf %244, %225 : vector<2x32xf32>
    %254 = arith.mulf %238, %246 : vector<2x32xf32>
    %255 = arith.addf %253, %254 : vector<2x32xf32>
    %256 = math.tanh %255 : vector<2x32xf32>
    %257 = arith.mulf %252, %256 : vector<2x32xf32>
    %258 = vector.extract_strided_slice %47 {offsets = [0, 0], sizes = [1, 32], strides = [1, 1]} : vector<2x32xf32> to vector<1x32xf32>
    %259 = vector.extract_strided_slice %77 {offsets = [0, 0], sizes = [1, 32], strides = [1, 1]} : vector<2x32xf32> to vector<1x32xf32>
    %260 = vector.extract_strided_slice %107 {offsets = [0, 0], sizes = [1, 32], strides = [1, 1]} : vector<2x32xf32> to vector<1x32xf32>
    %261 = vector.extract_strided_slice %137 {offsets = [0, 0], sizes = [1, 32], strides = [1, 1]} : vector<2x32xf32> to vector<1x32xf32>
    %262 = vector.extract_strided_slice %167 {offsets = [0, 0], sizes = [1, 32], strides = [1, 1]} : vector<2x32xf32> to vector<1x32xf32>
    %263 = vector.extract_strided_slice %197 {offsets = [0, 0], sizes = [1, 32], strides = [1, 1]} : vector<2x32xf32> to vector<1x32xf32>
    %264 = vector.extract_strided_slice %227 {offsets = [0, 0], sizes = [1, 32], strides = [1, 1]} : vector<2x32xf32> to vector<1x32xf32>
    %265 = vector.extract_strided_slice %257 {offsets = [0, 0], sizes = [1, 32], strides = [1, 1]} : vector<2x32xf32> to vector<1x32xf32>
    %266 = vector.extract_strided_slice %47 {offsets = [1, 0], sizes = [1, 32], strides = [1, 1]} : vector<2x32xf32> to vector<1x32xf32>
    %267 = vector.extract_strided_slice %77 {offsets = [1, 0], sizes = [1, 32], strides = [1, 1]} : vector<2x32xf32> to vector<1x32xf32>
    %268 = vector.extract_strided_slice %107 {offsets = [1, 0], sizes = [1, 32], strides = [1, 1]} : vector<2x32xf32> to vector<1x32xf32>
    %269 = vector.extract_strided_slice %137 {offsets = [1, 0], sizes = [1, 32], strides = [1, 1]} : vector<2x32xf32> to vector<1x32xf32>
    %270 = vector.extract_strided_slice %167 {offsets = [1, 0], sizes = [1, 32], strides = [1, 1]} : vector<2x32xf32> to vector<1x32xf32>
    %271 = vector.extract_strided_slice %197 {offsets = [1, 0], sizes = [1, 32], strides = [1, 1]} : vector<2x32xf32> to vector<1x32xf32>
    %272 = vector.extract_strided_slice %227 {offsets = [1, 0], sizes = [1, 32], strides = [1, 1]} : vector<2x32xf32> to vector<1x32xf32>
    %273 = vector.extract_strided_slice %257 {offsets = [1, 0], sizes = [1, 32], strides = [1, 1]} : vector<2x32xf32> to vector<1x32xf32>
    %274 = tpu.concatenate %258, %259, %260, %261, %262, %263, %264, %265, %266, %267, %268, %269, %270, %271, %272, %273 in 0 : vector<1x32xf32>, vector<1x32xf32>, vector<1x32xf32>, vector<1x32xf32>, vector<1x32xf32>, vector<1x32xf32>, vector<1x32xf32>, vector<1x32xf32>, vector<1x32xf32>, vector<1x32xf32>, vector<1x32xf32>, vector<1x32xf32>, vector<1x32xf32>, vector<1x32xf32>, vector<1x32xf32>, vector<1x32xf32> -> vector<16x32xf32>
    %c0_51 = arith.constant 0 : index
    %c0_52 = arith.constant 0 : index
    %275 = vector.load %arg8[%c0_51, %c0_52] : memref<16x32xf32, #tpu.memory_space<vmem>>, vector<16x32xf32>
    tpu.vector_store %arg8[%c0_51, %c0_52], %274 {strides = array<i32>} : memref<16x32xf32, #tpu.memory_space<vmem>>, vector<16x32xf32>,
    return
  }
}

</mosaic_0001>

<bundles_post_ra>
// kernel: encoder_forward.6
= control target key start
LH: loop header
LB: loop body
LE: loop exit
PB: predicated region body
PF: predicated region fallthrough
CT: control target
= control target key end

     0   :  { %vm27_vm0 = vcmask 261120   ;;  %vm109_vm1 = vcmask 785408   ;;  %s191_s1 = inlined_call_operand.vmem [shape: f32[32,96], index: 1, kind: input, shape index: {}]   ;;  %s192_s0 = inlined_call_operand.vmem [shape: f32[16,32], index: 0, kind: input, shape index: {}]   ;;  %s193_s2 = inlined_call_operand.vmem [shape: f32[1,96], index: 2, kind: input, shape index: {}]   ;;  %s194_s3 = inlined_call_operand.vmem [shape: f32[16,96], index: 3, kind: output, shape index: {}]  }
   0x1   :  { %v16_v0 = vld [vmem:[%s191_s1] sm:$0xff]  ;;  %v17_v1 = vld [vmem:[%s191_s1 + $0x8] sm:$0xff]  ;;  %v18_v2 = vld [vmem:[%s191_s1 + $0x10] sm:$0xff] }
   0x2   :  { %v136_v3 = vpack.c.bf16 %v17_v1, %v16_v0  ;;  %v19_v4 = vld [vmem:[%s191_s1 + $0x18] sm:$0xff]  ;;  %v14_v5 = vld [vmem:[%s192_s0] sm:$0xff]  ;;  %v15_v7 = vld [vmem:[%s192_s0 + $0x8] sm:$0xff] }
   0x3   :  { %v140_v6 = vpack.c.bf16 %v19_v4, %v18_v2  ;;  %133 = vmatprep.mubr.msk.f32.mxu0 %vm27_vm0, %v14_v5  ;;  %v116_v8 = vld [vmem:[%s193_s2] ss:$0 sm:$0xff] }
   0x4   :  { %137 = vmatprep.subr.bf16.mxu0 %v136_v3 }
   0x5   :  { %139 = vmatpush3.bf16.msra.mxu0 %v136_v3 }
   0x6   :  { %141 = vmatprep.subr.bf16.mxu0 %v140_v6 }
   0x9   :  { %143 = vmatpush3.bf16.msra.mxu0 %v140_v6 }
   0xc   :  { %134 = vmatmul.mubr.msk.f32.vlgmr.msra.gmra.mrb[0].mxu0 %vm27_vm0, %v15_v7 }
  0xdf   :  { %v135_v9 = vpop.f32.mrb[0].mxu0 }
  0xe0   :  { %v106_v10 = vadd.f32 %v135_v9, %v116_v8  ;;  %v100_v11 = vpop.f32.mrb[1].mxu0 }
  0xe1   :  { %v101_v12 = vadd.f32 %v116_v8, %v100_v11 }
  0xe2   :  { %111 = vst.msk [vmem:[%s194_s3 + $0x8] sm:$0xff] %vm109_vm1, %v106_v10 }
  0xe3   :  { %110 = vst.msk [vmem:[%s194_s3] sm:$0xff] %vm109_vm1, %v101_v12 }

// kernel: encoder_forward.7
= control target key start
LH: loop header
LB: loop body
LE: loop exit
PB: predicated region body
PF: predicated region fallthrough
CT: control target
= control target key end

     0   :  { %vm38_vm0 = vcmask 64512   ;;  %v1509_v0 = vmov 0.0   ;;  %vm1510_vm1 = vmmov 0   ;;  %s1735_s1 = inlined_call_operand.vmem [shape: f32[8,8,8], index: 1, kind: input, shape index: {}]   ;;  %s1736_s0 = inlined_call_operand.vmem [shape: f32[8,8,8], index: 0, kind: input, shape index: {}]   ;;  %s1737_s2 = inlined_call_operand.vmem [shape: f32[8,8,8], index: 2, kind: input, shape index: {}]   ;;  %s1738_s3 = inlined_call_operand.vmem [shape: f32[8,8,8], index: 3, kind: output, shape index: {}]  }
   0x1   :  { %1395 = vmatprep.subr.mxu0 %v1509_v0  ;;  %v30_v1 = vld [vmem:[%s1735_s1] sm:$0xff]  ;;  %1397 = vmatprep.mubr.msk.f32.mxu0 %vm1510_vm1, %v1509_v0  ;;  %v31_v3 = vld [vmem:[%s1735_s1 + $0x8] sm:$0xff]  ;;  %v16_v6 = vld [vmem:[%s1736_s0 + $0x10] sm:$0xff] }
   0x2   :  { %v14_v2 = vld [vmem:[%s1736_s0] sm:$0xff]  ;;  %1396 = vmatpush3.xpose.msk.msra.mxu0 %vm38_vm0, %v30_v1  ;;  %1400 = vmatprep.subr.mxu1 %v1509_v0  ;;  %v15_v5 = vld [vmem:[%s1736_s0 + $0x8] sm:$0xff]  ;;  %v32_v7 = vld [vmem:[%s1735_s1 + $0x10] sm:$0xff]  ;;  %v24_v10 = vmul.f32 0.25, %v16_v6 }
   0x3   :  { %v22_v4 = vmul.f32 0.25, %v14_v2  ;;  %1405 = vmatprep.subr.mxu0 %v1509_v0  ;;  %1401 = vmatpush3.xpose.msk.msra.mxu1 %vm38_vm0, %v31_v3  ;;  %v23_v8 = vmul.f32 0.25, %v15_v5  ;;  %v17_v9 = vld [vmem:[%s1736_s0 + $0x18] sm:$0xff]  ;;  %v18_v12 = vld [vmem:[%s1736_s0 + $0x20] sm:$0xff]  ;;  %v19_v15 = vld [vmem:[%s1736_s0 + $0x28] sm:$0xff] }
   0x4   :  { %1402 = vmatprep.mubr.msk.f32.mxu1 %vm1510_vm1, %v1509_v0  ;;  %1410 = vmatprep.subr.mxu1 %v1509_v0  ;;  %v33_v11 = vld [vmem:[%s1735_s1 + $0x18] sm:$0xff]  ;;  %v34_v13 = vld [vmem:[%s1735_s1 + $0x20] sm:$0xff]  ;;  %v25_v14 = vmul.f32 0.25, %v17_v9  ;;  %v26_v16 = vmul.f32 0.25, %v18_v12  ;;  %v35_v17 = vld [vmem:[%s1735_s1 + $0x28] sm:$0xff]  ;;  %v27_v20 = vmul.f32 0.25, %v19_v15 }
   0x5   :  { %1398 = vmatmul.mubr.msk.f32.vlgmr.msra.gmra.mrb[0].mxu0 %vm38_vm0, %v22_v4  ;;  %v20_v18 = vld [vmem:[%s1736_s0 + $0x30] sm:$0xff]  ;;  %v21_v21 = vld [vmem:[%s1736_s0 + $0x38] sm:$0xff] }
   0x6   :  { %1406 = vmatpush3.xpose.msk.msra.mxu0 %vm38_vm0, %v32_v7  ;;  %1407 = vmatprep.mubr.msk.f32.mxu0 %vm1510_vm1, %v1509_v0  ;;  %v36_v19 = vld [vmem:[%s1735_s1 + $0x30] sm:$0xff]  ;;  %v28_v22 = vmul.f32 0.25, %v20_v18  ;;  %v37_v23 = vld [vmem:[%s1735_s1 + $0x38] sm:$0xff]  ;;  %v29_v24 = vmul.f32 0.25, %v21_v21 }
   0x7   :  { %1403 = vmatmul.mubr.msk.f32.vlgmr.msra.gmra.mrb[0].mxu1 %vm38_vm0, %v23_v8  ;;  %1415 = vmatprep.subr.mxu0 %v1509_v0 }
   0x8   :  { %1411 = vmatpush3.xpose.msk.msra.mxu1 %vm38_vm0, %v33_v11  ;;  %1412 = vmatprep.mubr.msk.f32.mxu1 %vm1510_vm1, %v1509_v0 }
   0x9   :  { %1408 = vmatmul.mubr.msk.f32.vlgmr.msra.gmra.mrb[2].mxu0 %vm38_vm0, %v24_v10  ;;  %1420 = vmatprep.subr.mxu1 %v1509_v0 }
   0xa   :  { %1416 = vmatpush3.xpose.msk.msra.mxu0 %vm38_vm0, %v34_v13  ;;  %1417 = vmatprep.mubr.msk.f32.mxu0 %vm1510_vm1, %v1509_v0 }
   0xb   :  { %1413 = vmatmul.mubr.msk.f32.vlgmr.msra.gmra.mrb[2].mxu1 %vm38_vm0, %v25_v14  ;;  %1425 = vmatprep.subr.mxu0 %v1509_v0 }
   0xc   :  { %1421 = vmatpush3.xpose.msk.msra.mxu1 %vm38_vm0, %v35_v17  ;;  %1422 = vmatprep.mubr.msk.f32.mxu1 %vm1510_vm1, %v1509_v0 }
   0xd   :  { %1418 = vmatmul.mubr.msk.f32.vlgmr.msra.gmra.mrb[4].mxu0 %vm38_vm0, %v26_v16  ;;  %1430 = vmatprep.subr.mxu1 %v1509_v0 }
   0xe   :  { %1426 = vmatpush3.xpose.msk.msra.mxu0 %vm38_vm0, %v36_v19  ;;  %1427 = vmatprep.mubr.msk.f32.mxu0 %vm1510_vm1, %v1509_v0 }
   0xf   :  { %1423 = vmatmul.mubr.msk.f32.vlgmr.msra.gmra.mrb[4].mxu1 %vm38_vm0, %v27_v20  ;;  %1435 = vmatprep.subr.mxu0 %v1509_v0 }
  0x10   :  { %1431 = vmatpush3.xpose.msk.msra.mxu1 %vm38_vm0, %v37_v23  ;;  %1432 = vmatprep.mubr.msk.f32.mxu1 %vm1510_vm1, %v1509_v0 }
  0x11   :  { %1428 = vmatmul.mubr.msk.f32.vlgmr.msra.gmra.mrb[6].mxu0 %vm38_vm0, %v28_v22  ;;  %1440 = vmatprep.subr.mxu1 %v1509_v0 }
  0x12   :  { %1437 = vmatprep.mubr.msk.f32.mxu0 %vm1510_vm1, %v1509_v0 }
  0x13   :  { %1433 = vmatmul.mubr.msk.f32.vlgmr.msra.gmra.mrb[6].mxu1 %vm38_vm0, %v29_v24 }
  0x14   :  { %1442 = vmatprep.mubr.msk.f32.mxu1 %vm1510_vm1, %v1509_v0 }
  0xd8   :  { %v111_v25 = vpop.f32.mrb[0].mxu0 }
  0xd9   :  { %v1399_v26 = vpop.f32.mrb[1].mxu0  ;;  %v647_v27 = vsel %vm38_vm0, %v111_v25, -inf }
  0xda   :  { %648 = vmax.xlane.f32.xlu0 %v647_v27  ;;  %v187_v28 = vpop.f32.mrb[0].mxu1  ;;  %v735_v26 = vld [vmem:[%s1737_s2] sm:$0xff]  ;;  %v736_v27 = vld [vmem:[%s1737_s2 + $0x8] sm:$0xff] }
  0xdb   :  { %v1404_v29 = vpop.f32.mrb[1].mxu1  ;;  %v650_v30 = vsel %vm38_vm0, %v187_v28, -inf  ;;  %1436 = vmatpush3.msra.mxu0 %v735_v26  ;;  %1441 = vmatpush3.msra.mxu1 %v736_v27 }
  0xdc   :  { %v263_v31 = vpop.f32.mrb[2].mxu0  ;;  %1445 = vmatprep.subr.mxu0 %v1509_v0  ;;  %1450 = vmatprep.subr.mxu1 %v1509_v0 }
  0xdd   :  { %v1409_v32 = vpop.f32.mrb[3].mxu0  ;;  %v653_v33 = vsel %vm38_vm0, %v263_v31, -inf }
  0xde   :  { %651 = vmax.xlane.f32.xlu0 %v650_v30  ;;  %654 = vmax.xlane.f32.xlu1 %v653_v33  ;;  %v339_v34 = vpop.f32.mrb[2].mxu1 }
  0xdf   :  { %v1414_v35 = vpop.f32.mrb[3].mxu1  ;;  %v656_v36 = vsel %vm38_vm0, %v339_v34, -inf }
  0xe0   :  { %v415_v37 = vpop.f32.mrb[4].mxu0 }
  0xe1   :  { %v659_v38 = vsel %vm38_vm0, %v415_v37, -inf  ;;  %v1419_v39 = vpop.f32.mrb[5].mxu0 }
  0xe2   :  { %657 = vmax.xlane.f32.xlu1 %v656_v36  ;;  %660 = vmax.xlane.f32.xlu0 %v659_v38  ;;  %v491_v40 = vpop.f32.mrb[4].mxu1  ;;  %v737_v36 = vld [vmem:[%s1737_s2 + $0x10] sm:$0xff] }
  0xe3   :  { %v1424_v41 = vpop.f32.mrb[5].mxu1  ;;  %v662_v42 = vsel %vm38_vm0, %v491_v40, -inf }
  0xe4   :  { %v567_v43 = vpop.f32.mrb[6].mxu0 }
  0xe5   :  { %v665_v44 = vsel %vm38_vm0, %v567_v43, -inf  ;;  %v1429_v45 = vpop.f32.mrb[7].mxu0 }
  0xe6   :  { %663 = vmax.xlane.f32.xlu1 %v662_v42  ;;  %666 = vmax.xlane.f32.xlu0 %v665_v44  ;;  %v643_v46 = vpop.f32.mrb[6].mxu1  ;;  %v738_v42 = vld [vmem:[%s1737_s2 + $0x18] sm:$0xff]  ;;  %v739_v44 = vld [vmem:[%s1737_s2 + $0x20] sm:$0xff] }
  0xe7   :  { %v1434_v47 = vpop.f32.mrb[7].mxu1  ;;  %v668_v48 = vsel %vm38_vm0, %v643_v46, -inf }
  0xea   :  { %669 = vmax.xlane.f32.xlu1 %v668_v48  ;;  %v740_v48 = vld [vmem:[%s1737_s2 + $0x28] sm:$0xff] }
 0x167   :  { %v649_v49 = vpop.xlane.xlu0 %648 }
 0x168   :  { %v671_v50 = vsub.f32 %v111_v25, %v649_v49 }
 0x16a   :  { %v679_v51 = vmul.f32 1.442695, %v671_v50  ;;  %v741_v50 = vld [vmem:[%s1737_s2 + $0x30] sm:$0xff] }
 0x16b   :  { %v652_v52 = vpop.xlane.xlu0 %651  ;;  %v655_v53 = vpop.xlane.xlu1 %654 }
 0x16c   :  { %1477 = vpow2.f32 %v679_v51  ;;  %v672_v54 = vsub.f32 %v187_v28, %v652_v52  ;;  %v673_v55 = vsub.f32 %v263_v31, %v655_v53 }
 0x16e   :  { %v681_v56 = vmul.f32 1.442695, %v672_v54  ;;  %v683_v57 = vmul.f32 1.442695, %v673_v55  ;;  %v742_v54 = vld [vmem:[%s1737_s2 + $0x38] sm:$0xff] }
 0x16f   :  { %v658_v58 = vpop.xlane.xlu1 %657  ;;  %v661_v59 = vpop.xlane.xlu0 %660 }
 0x170   :  { %1479 = vpow2.f32 %v681_v56  ;;  %v674_v60 = vsub.f32 %v339_v34, %v658_v58  ;;  %v675_v61 = vsub.f32 %v415_v37, %v661_v59 }
 0x171   :  { %1481 = vpow2.f32 %v683_v57 }
 0x172   :  { %v685_v62 = vmul.f32 1.442695, %v674_v60  ;;  %v687_v63 = vmul.f32 1.442695, %v675_v61 }
 0x173   :  { %v664_v1 = vpop.xlane.xlu1 %663  ;;  %v667_v2 = vpop.xlane.xlu0 %666 }
 0x174   :  { %1483 = vpow2.f32 %v685_v62  ;;  %v676_v3 = vsub.f32 %v491_v40, %v664_v1  ;;  %v677_v4 = vsub.f32 %v567_v43, %v667_v2 }
 0x175   :  { %1485 = vpow2.f32 %v687_v63 }
 0x176   :  { %v1478_v5 = vpop.eup %1477  ;;  %v689_v6 = vmul.f32 1.442695, %v676_v3  ;;  %v691_v7 = vmul.f32 1.442695, %v677_v4 }
 0x177   :  { %v670_v8 = vpop.xlane.xlu1 %669  ;;  %v695_v9 = vsel %vm38_vm0, %v1478_v5, 0.0 }
 0x178   :  { %1487 = vpow2.f32 %v689_v6  ;;  %v678_v10 = vsub.f32 %v643_v46, %v670_v8  ;;  %696 = vadd.xlane.f32.xlu0 %v695_v9 }
 0x179   :  { %1489 = vpow2.f32 %v691_v7 }
 0x17a   :  { %v1480_v11 = vpop.eup %1479  ;;  %v693_v12 = vmul.f32 1.442695, %v678_v10 }
 0x17b   :  { %v1482_v13 = vpop.eup %1481  ;;  %v698_v14 = vsel %vm38_vm0, %v1480_v11, 0.0 }
 0x17c   :  { %1491 = vpow2.f32 %v693_v12  ;;  %699 = vadd.xlane.f32.xlu1 %v698_v14  ;;  %v701_v15 = vsel %vm38_vm0, %v1482_v13, 0.0 }
 0x17d   :  { %702 = vadd.xlane.f32.xlu0 %v701_v15 }
 0x17e   :  { %v1484_v16 = vpop.eup %1483 }
 0x17f   :  { %v1486_v17 = vpop.eup %1485  ;;  %v704_v18 = vsel %vm38_vm0, %v1484_v16, 0.0 }
 0x180   :  { %705 = vadd.xlane.f32.xlu1 %v704_v18  ;;  %v707_v19 = vsel %vm38_vm0, %v1486_v17, 0.0 }
 0x181   :  { %708 = vadd.xlane.f32.xlu0 %v707_v19 }
 0x182   :  { %v1638_v20 = vpop.eup %1487 }
 0x183   :  { %v1640_v21 = vpop.eup %1489  ;;  %v710_v22 = vsel %vm38_vm0, %v1638_v20, 0.0 }
 0x184   :  { %711 = vadd.xlane.f32.xlu1 %v710_v22  ;;  %v713_v23 = vsel %vm38_vm0, %v1640_v21, 0.0 }
 0x185   :  { %714 = vadd.xlane.f32.xlu0 %v713_v23 }
 0x186   :  { %v1646_v24 = vpop.eup %1491 }
 0x187   :  { %v716_v25 = vsel %vm38_vm0, %v1646_v24, 0.0 }
 0x188   :  { %717 = vadd.xlane.f32.xlu1 %v716_v25 }
 0x205   :  { %v697_v28 = vpop.xlane.xlu0 %696 }
 0x206   :  { %1493 = vrcp.f32 %v697_v28 }
 0x209   :  { %v700_v29 = vpop.xlane.xlu1 %699 }
 0x20a   :  { %1495 = vrcp.f32 %v700_v29  ;;  %v703_v30 = vpop.xlane.xlu0 %702 }
 0x20b   :  { %1497 = vrcp.f32 %v703_v30 }
 0x20d   :  { %v706_v31 = vpop.xlane.xlu1 %705 }
 0x20e   :  { %1499 = vrcp.f32 %v706_v31  ;;  %v709_v32 = vpop.xlane.xlu0 %708 }
 0x20f   :  { %1501 = vrcp.f32 %v709_v32 }
 0x210   :  { %v1494_v33 = vpop.eup %1493 }
 0x211   :  { %v720_v34 = vmul.f32 %v1494_v33, %v1478_v5  ;;  %v712_v35 = vpop.xlane.xlu1 %711 }
 0x212   :  { %1503 = vrcp.f32 %v712_v35  ;;  %v715_v37 = vpop.xlane.xlu0 %714 }
 0x213   :  { %1505 = vrcp.f32 %v715_v37  ;;  %1438 = vmatmul.mubr.msk.f32.vlgmr.msra.gmra.mrb[8].mxu0 %vm38_vm0, %v720_v34 }
 0x214   :  { %v1496_v38 = vpop.eup %1495  ;;  %1446 = vmatpush3.msra.mxu0 %v737_v36  ;;  %1447 = vmatprep.mubr.msk.f32.mxu0 %vm1510_vm1, %v1509_v0 }
 0x215   :  { %v1498_v39 = vpop.eup %1497  ;;  %v722_v40 = vmul.f32 %v1496_v38, %v1480_v11  ;;  %v718_v41 = vpop.xlane.xlu1 %717  ;;  %1455 = vmatprep.subr.mxu0 %v1509_v0 }
 0x216   :  { %v724_v43 = vmul.f32 %v1498_v39, %v1482_v13  ;;  %1507 = vrcp.f32 %v718_v41 }
 0x217   :  { %1443 = vmatmul.mubr.msk.f32.vlgmr.msra.gmra.mrb[8].mxu1 %vm38_vm0, %v722_v40 }
 0x218   :  { %v1500_v45 = vpop.eup %1499  ;;  %1448 = vmatmul.mubr.msk.f32.vlgmr.msra.gmra.mrb[10].mxu0 %vm38_vm0, %v724_v43  ;;  %1451 = vmatpush3.msra.mxu1 %v738_v42 }
 0x219   :  { %v1502_v46 = vpop.eup %1501  ;;  %v726_v47 = vmul.f32 %v1500_v45, %v1484_v16  ;;  %1452 = vmatprep.mubr.msk.f32.mxu1 %vm1510_vm1, %v1509_v0  ;;  %1456 = vmatpush3.msra.mxu0 %v739_v44 }
 0x21a   :  { %v728_v49 = vmul.f32 %v1502_v46, %v1486_v17  ;;  %1457 = vmatprep.mubr.msk.f32.mxu0 %vm1510_vm1, %v1509_v0  ;;  %1460 = vmatprep.subr.mxu1 %v1509_v0 }
 0x21b   :  { %1453 = vmatmul.mubr.msk.f32.vlgmr.msra.gmra.mrb[10].mxu1 %vm38_vm0, %v726_v47  ;;  %1465 = vmatprep.subr.mxu0 %v1509_v0 }
 0x21c   :  { %v1504_v51 = vpop.eup %1503  ;;  %1458 = vmatmul.mubr.msk.f32.vlgmr.msra.gmra.mrb[12].mxu0 %vm38_vm0, %v728_v49  ;;  %1461 = vmatpush3.msra.mxu1 %v740_v48 }
 0x21d   :  { %v1506_v52 = vpop.eup %1505  ;;  %v730_v53 = vmul.f32 %v1504_v51, %v1638_v20  ;;  %1462 = vmatprep.mubr.msk.f32.mxu1 %vm1510_vm1, %v1509_v0  ;;  %1466 = vmatpush3.msra.mxu0 %v741_v50 }
 0x21e   :  { %v732_v55 = vmul.f32 %v1506_v52, %v1640_v21  ;;  %1467 = vmatprep.mubr.msk.f32.mxu0 %vm1510_vm1, %v1509_v0  ;;  %1470 = vmatprep.subr.mxu1 %v1509_v0 }
 0x21f   :  { %1463 = vmatmul.mubr.msk.f32.vlgmr.msra.gmra.mrb[12].mxu1 %vm38_vm0, %v730_v53 }
 0x220   :  { %v1508_v56 = vpop.eup %1507  ;;  %1468 = vmatmul.mubr.msk.f32.vlgmr.msra.gmra.mrb[14].mxu0 %vm38_vm0, %v732_v55  ;;  %1471 = vmatpush3.msra.mxu1 %v742_v54 }
 0x221   :  { %v734_v57 = vmul.f32 %v1508_v56, %v1646_v24  ;;  %1472 = vmatprep.mubr.msk.f32.mxu1 %vm1510_vm1, %v1509_v0 }
 0x223   :  { %1473 = vmatmul.mubr.msk.f32.vlgmr.msra.gmra.mrb[14].mxu1 %vm38_vm0, %v734_v57 }
 0x2e6   :  { %v812_v58 = vpop.f32.mrb[8].mxu0 }
 0x2e7   :  { %1327 = vst.msk [vmem:[%s1738_s3] sm:$0xff] %vm38_vm0, %v812_v58  ;;  %v1439_v59 = vpop.f32.mrb[9].mxu0 }
 0x2ea   :  { %v885_v60 = vpop.f32.mrb[8].mxu1 }
 0x2eb   :  { %1328 = vst.msk [vmem:[%s1738_s3 + $0x8] sm:$0xff] %vm38_vm0, %v885_v60  ;;  %v958_v61 = vpop.f32.mrb[10].mxu0  ;;  %v1444_v62 = vpop.f32.mrb[9].mxu1 }
 0x2ec   :  { %1329 = vst.msk [vmem:[%s1738_s3 + $0x10] sm:$0xff] %vm38_vm0, %v958_v61  ;;  %v1449_v0 = vpop.f32.mrb[11].mxu0 }
 0x2ee   :  { %v1031_v63 = vpop.f32.mrb[10].mxu1 }
 0x2ef   :  { %1330 = vst.msk [vmem:[%s1738_s3 + $0x18] sm:$0xff] %vm38_vm0, %v1031_v63  ;;  %v1104_v1 = vpop.f32.mrb[12].mxu0  ;;  %v1454_v2 = vpop.f32.mrb[11].mxu1 }
 0x2f0   :  { %1331 = vst.msk [vmem:[%s1738_s3 + $0x20] sm:$0xff] %vm38_vm0, %v1104_v1  ;;  %v1459_v3 = vpop.f32.mrb[13].mxu0 }
 0x2f2   :  { %v1177_v4 = vpop.f32.mrb[12].mxu1 }
 0x2f3   :  { %1332 = vst.msk [vmem:[%s1738_s3 + $0x28] sm:$0xff] %vm38_vm0, %v1177_v4  ;;  %v1250_v5 = vpop.f32.mrb[14].mxu0  ;;  %v1464_v6 = vpop.f32.mrb[13].mxu1 }
 0x2f4   :  { %1333 = vst.msk [vmem:[%s1738_s3 + $0x30] sm:$0xff] %vm38_vm0, %v1250_v5  ;;  %v1469_v7 = vpop.f32.mrb[15].mxu0 }
 0x2f6   :  { %v1323_v8 = vpop.f32.mrb[14].mxu1 }
 0x2f7   :  { %1334 = vst.msk [vmem:[%s1738_s3 + $0x38] sm:$0xff] %vm38_vm0, %v1323_v8  ;;  %v1474_v9 = vpop.f32.mrb[15].mxu1 }

// kernel: encoder_forward.10
= control target key start
LH: loop header
LB: loop body
LE: loop exit
PB: predicated region body
PF: predicated region fallthrough
CT: control target
= control target key end

     0   :  { %vm41_vm0 = vcmask 64512   ;;  %v1563_v3 = vmov 0.0   ;;  %vm1564_vm1 = vmmov 0   ;;  %s1817_s0 = inlined_call_operand.vmem [shape: f32[8,8,8], index: 0, kind: input, shape index: {}]   ;;  %s1818_s1 = inlined_call_operand.vmem [shape: f32[8,8,8], index: 1, kind: input, shape index: {}]   ;;  %s1819_s2 = inlined_call_operand.vmem [shape: f32[8,8,8], index: 2, kind: input, shape index: {}]   ;;  %s1820_s3 = inlined_call_operand.vmem [shape: f32[8,8,8], index: 3, kind: output, shape index: {0}]   ;;  %s1821_s4 = inlined_call_operand.hbm [shape: f32[8,8,8], index: 4, kind: output, shape index: {1}]  }
   0x1   :  { %v33_v0 = vld [vmem:[%s1818_s1] sm:$0xff]  ;;  %v34_v2 = vld [vmem:[%s1818_s1 + $0x8] sm:$0xff]  ;;  %1422 = vmatprep.subr.mxu0 %v1563_v3  ;;  %1424 = vmatprep.mubr.msk.f32.mxu0 %vm1564_vm1, %v1563_v3  ;;  %v19_v6 = vld [vmem:[%s1817_s0 + $0x10] sm:$0xff] }
   0x2   :  { %v17_v1 = vld [vmem:[%s1817_s0] sm:$0xff]  ;;  %v18_v5 = vld [vmem:[%s1817_s0 + $0x8] sm:$0xff]  ;;  %1423 = vmatpush3.xpose.msk.msra.mxu0 %vm41_vm0, %v33_v0  ;;  %1427 = vmatprep.subr.mxu1 %v1563_v3  ;;  %v35_v7 = vld [vmem:[%s1818_s1 + $0x10] sm:$0xff]  ;;  %v27_v10 = vmul.f32 0.25, %v19_v6 }
   0x3   :  { %v25_v4 = vmul.f32 0.25, %v17_v1  ;;  %1432 = vmatprep.subr.mxu0 %v1563_v3  ;;  %1428 = vmatpush3.xpose.msk.msra.mxu1 %vm41_vm0, %v34_v2  ;;  %v26_v8 = vmul.f32 0.25, %v18_v5  ;;  %v20_v9 = vld [vmem:[%s1817_s0 + $0x18] sm:$0xff] }
   0x4   :  { %1429 = vmatprep.mubr.msk.f32.mxu1 %vm1564_vm1, %v1563_v3  ;;  %1437 = vmatprep.subr.mxu1 %v1563_v3  ;;  %v36_v11 = vld [vmem:[%s1818_s1 + $0x18] sm:$0xff] }
   0x5   :  { %1425 = vmatmul.mubr.msk.f32.vlgmr.msra.gmra.mrb[0].mxu0 %vm41_vm0, %v25_v4 }
   0x6   :  { %10 = vsyncpa [#allocation3], 0  ;;  %1433 = vmatpush3.xpose.msk.msra.mxu0 %vm41_vm0, %v35_v7  ;;  %1434 = vmatprep.mubr.msk.f32.mxu0 %vm1564_vm1, %v1563_v3  ;;  %v21_v12 = vld [vmem:[%s1817_s0 + $0x20] sm:$0xff]  ;;  %v28_v14 = vmul.f32 0.25, %v20_v9  ;;  %v22_v15 = vld [vmem:[%s1817_s0 + $0x28] sm:$0xff] }
   0x7   :  { %1430 = vmatmul.mubr.msk.f32.vlgmr.msra.gmra.mrb[0].mxu1 %vm41_vm0, %v26_v8  ;;  %1442 = vmatprep.subr.mxu0 %v1563_v3  ;;  %v37_v13 = vld [vmem:[%s1818_s1 + $0x20] sm:$0xff]  ;;  %v29_v16 = vmul.f32 0.25, %v21_v12  ;;  %v38_v17 = vld [vmem:[%s1818_s1 + $0x28] sm:$0xff]  ;;  %v23_v18 = vld [vmem:[%s1817_s0 + $0x30] sm:$0xff]  ;;  %v30_v20 = vmul.f32 0.25, %v22_v15 }
   0x8   :  { %1438 = vmatpush3.xpose.msk.msra.mxu1 %vm41_vm0, %v36_v11  ;;  %1439 = vmatprep.mubr.msk.f32.mxu1 %vm1564_vm1, %v1563_v3  ;;  %v39_v19 = vld [vmem:[%s1818_s1 + $0x30] sm:$0xff]  ;;  %v24_v21 = vld [vmem:[%s1817_s0 + $0x38] sm:$0xff]  ;;  %v31_v22 = vmul.f32 0.25, %v23_v18 }
   0x9   :  { %1435 = vmatmul.mubr.msk.f32.vlgmr.msra.gmra.mrb[2].mxu0 %vm41_vm0, %v27_v10  ;;  %1447 = vmatprep.subr.mxu1 %v1563_v3  ;;  %v40_v23 = vld [vmem:[%s1818_s1 + $0x38] sm:$0xff]  ;;  %v32_v24 = vmul.f32 0.25, %v24_v21 }
   0xa   :  { %1443 = vmatpush3.xpose.msk.msra.mxu0 %vm41_vm0, %v37_v13  ;;  %1444 = vmatprep.mubr.msk.f32.mxu0 %vm1564_vm1, %v1563_v3 }
   0xb   :  { %1440 = vmatmul.mubr.msk.f32.vlgmr.msra.gmra.mrb[2].mxu1 %vm41_vm0, %v28_v14  ;;  %1452 = vmatprep.subr.mxu0 %v1563_v3 }
   0xc   :  { %1448 = vmatpush3.xpose.msk.msra.mxu1 %vm41_vm0, %v38_v17  ;;  %1449 = vmatprep.mubr.msk.f32.mxu1 %vm1564_vm1, %v1563_v3 }
   0xd   :  { %1445 = vmatmul.mubr.msk.f32.vlgmr.msra.gmra.mrb[4].mxu0 %vm41_vm0, %v29_v16  ;;  %1457 = vmatprep.subr.mxu1 %v1563_v3 }
   0xe   :  { %1453 = vmatpush3.xpose.msk.msra.mxu0 %vm41_vm0, %v39_v19  ;;  %1454 = vmatprep.mubr.msk.f32.mxu0 %vm1564_vm1, %v1563_v3 }
   0xf   :  { %1450 = vmatmul.mubr.msk.f32.vlgmr.msra.gmra.mrb[4].mxu1 %vm41_vm0, %v30_v20  ;;  %1462 = vmatprep.subr.mxu0 %v1563_v3 }
  0x10   :  { %1458 = vmatpush3.xpose.msk.msra.mxu1 %vm41_vm0, %v40_v23  ;;  %1459 = vmatprep.mubr.msk.f32.mxu1 %vm1564_vm1, %v1563_v3 }
  0x11   :  { %1455 = vmatmul.mubr.msk.f32.vlgmr.msra.gmra.mrb[6].mxu0 %vm41_vm0, %v31_v22  ;;  %1467 = vmatprep.subr.mxu1 %v1563_v3 }
  0x12   :  { %1464 = vmatprep.mubr.msk.f32.mxu0 %vm1564_vm1, %v1563_v3 }
  0x13   :  { %1460 = vmatmul.mubr.msk.f32.vlgmr.msra.gmra.mrb[6].mxu1 %vm41_vm0, %v32_v24 }
  0x14   :  { %1469 = vmatprep.mubr.msk.f32.mxu1 %vm1564_vm1, %v1563_v3 }
  0xd8   :  { %v114_v25 = vpop.f32.mrb[0].mxu0 }
  0xd9   :  { %v1426_v26 = vpop.f32.mrb[1].mxu0  ;;  %v650_v27 = vsel %vm41_vm0, %v114_v25, -inf }
  0xda   :  { %651 = vmax.xlane.f32.xlu0 %v650_v27  ;;  %v190_v28 = vpop.f32.mrb[0].mxu1  ;;  %v738_v26 = vld [vmem:[%s1819_s2] sm:$0xff]  ;;  %v739_v27 = vld [vmem:[%s1819_s2 + $0x8] sm:$0xff] }
  0xdb   :  { %v1431_v29 = vpop.f32.mrb[1].mxu1  ;;  %v653_v30 = vsel %vm41_vm0, %v190_v28, -inf  ;;  %1463 = vmatpush3.msra.mxu0 %v738_v26  ;;  %1468 = vmatpush3.msra.mxu1 %v739_v27 }
  0xdc   :  { %v266_v31 = vpop.f32.mrb[2].mxu0  ;;  %1472 = vmatprep.subr.mxu0 %v1563_v3  ;;  %1477 = vmatprep.subr.mxu1 %v1563_v3 }
  0xdd   :  { %v1436_v32 = vpop.f32.mrb[3].mxu0  ;;  %v656_v33 = vsel %vm41_vm0, %v266_v31, -inf }
  0xde   :  { %654 = vmax.xlane.f32.xlu0 %v653_v30  ;;  %657 = vmax.xlane.f32.xlu1 %v656_v33  ;;  %v342_v34 = vpop.f32.mrb[2].mxu1 }
  0xdf   :  { %v1441_v35 = vpop.f32.mrb[3].mxu1  ;;  %v659_v36 = vsel %vm41_vm0, %v342_v34, -inf }
  0xe0   :  { %v418_v37 = vpop.f32.mrb[4].mxu0 }
  0xe1   :  { %v662_v38 = vsel %vm41_vm0, %v418_v37, -inf  ;;  %v1446_v39 = vpop.f32.mrb[5].mxu0 }
  0xe2   :  { %660 = vmax.xlane.f32.xlu1 %v659_v36  ;;  %663 = vmax.xlane.f32.xlu0 %v662_v38  ;;  %v494_v40 = vpop.f32.mrb[4].mxu1  ;;  %v740_v36 = vld [vmem:[%s1819_s2 + $0x10] sm:$0xff] }
  0xe3   :  { %v1451_v41 = vpop.f32.mrb[5].mxu1  ;;  %v665_v42 = vsel %vm41_vm0, %v494_v40, -inf }
  0xe4   :  { %v570_v43 = vpop.f32.mrb[6].mxu0 }
  0xe5   :  { %v668_v44 = vsel %vm41_vm0, %v570_v43, -inf  ;;  %v1456_v45 = vpop.f32.mrb[7].mxu0 }
  0xe6   :  { %666 = vmax.xlane.f32.xlu1 %v665_v42  ;;  %669 = vmax.xlane.f32.xlu0 %v668_v44  ;;  %v646_v46 = vpop.f32.mrb[6].mxu1  ;;  %v741_v42 = vld [vmem:[%s1819_s2 + $0x18] sm:$0xff]  ;;  %v742_v44 = vld [vmem:[%s1819_s2 + $0x20] sm:$0xff] }
  0xe7   :  { %v1461_v47 = vpop.f32.mrb[7].mxu1  ;;  %v671_v48 = vsel %vm41_vm0, %v646_v46, -inf }
  0xea   :  { %672 = vmax.xlane.f32.xlu1 %v671_v48  ;;  %v743_v48 = vld [vmem:[%s1819_s2 + $0x28] sm:$0xff] }
 0x167   :  { %v652_v49 = vpop.xlane.xlu0 %651 }
 0x168   :  { %v674_v50 = vsub.f32 %v114_v25, %v652_v49 }
 0x16a   :  { %v682_v51 = vmul.f32 1.442695, %v674_v50  ;;  %v744_v50 = vld [vmem:[%s1819_s2 + $0x30] sm:$0xff] }
 0x16b   :  { %v655_v52 = vpop.xlane.xlu0 %654  ;;  %v658_v53 = vpop.xlane.xlu1 %657 }
 0x16c   :  { %1507 = vpow2.f32 %v682_v51  ;;  %v675_v54 = vsub.f32 %v190_v28, %v655_v52  ;;  %v676_v55 = vsub.f32 %v266_v31, %v658_v53 }
 0x16e   :  { %v684_v56 = vmul.f32 1.442695, %v675_v54  ;;  %v686_v57 = vmul.f32 1.442695, %v676_v55  ;;  %v745_v54 = vld [vmem:[%s1819_s2 + $0x38] sm:$0xff]  ;;  %s1565_s2 = smov [#allocation2]  }
 0x16f   :  { %v661_v58 = vpop.xlane.xlu1 %660  ;;  %v664_v59 = vpop.xlane.xlu0 %663  ;;  %s1353_s9 = sshll.u32 %s1565_s2, 4  ;;  %s1354_s9 = int_to_ptr.vmem [resolvable:$true] %s1353_s9 }
 0x170   :  { %1509 = vpow2.f32 %v684_v56  ;;  %v677_v60 = vsub.f32 %v342_v34, %v661_v58  ;;  %v678_v61 = vsub.f32 %v418_v37, %v664_v59  ;;  %s1539_s10 = scalar_lea.vmem %s1354_s9, 1024  ;;  %p1544_p1 = scmp.lt.s32.totalorder %s1354_s9, %s1354_s9 }
 0x171   :  { %1511 = vpow2.f32 %v686_v57  ;;  %p1540_p0 = scmp.ne.s32.totalorder %s1354_s9, %s1539_s10  ;;  %p1545_p2 = scmp.lt.s32.totalorder %s1539_s10, %s1539_s10 }
 0x172   :  { %v688_v62 = vmul.f32 1.442695, %v677_v60  ;;  %v690_v63 = vmul.f32 1.442695, %v678_v61 }
 0x173   :  { %v667_v0 = vpop.xlane.xlu1 %666  ;;  %v670_v1 = vpop.xlane.xlu0 %669  ;;  %p1546_p3 = por %p1545_p2, %p1544_p1 }
 0x174   :  { %1513 = vpow2.f32 %v688_v62  ;;  %v679_v2 = vsub.f32 %v494_v40, %v667_v0  ;;  %v680_v4 = vsub.f32 %v570_v43, %v670_v1 }
 0x175   :  { %1515 = vpow2.f32 %v690_v63  ;;  %p1547_p4 = pnand %p1546_p3, %p1540_p0 }
 0x176   :  { %v1508_v5 = vpop.eup %1507  ;;  %v692_v6 = vmul.f32 1.442695, %v679_v2  ;;  %v694_v7 = vmul.f32 1.442695, %v680_v4 }
 0x177   :  { %v673_v8 = vpop.xlane.xlu1 %672  ;;  %v698_v9 = vsel %vm41_vm0, %v1508_v5, 0.0 }
 0x178   :  { %1517 = vpow2.f32 %v692_v6  ;;  %v681_v10 = vsub.f32 %v646_v46, %v673_v8  ;;  %699 = vadd.xlane.f32.xlu0 %v698_v9 }
 0x179   :  { %1519 = vpow2.f32 %v694_v7 }
 0x17a   :  { %v1510_v11 = vpop.eup %1509  ;;  %v696_v12 = vmul.f32 1.442695, %v681_v10 }
 0x17b   :  { %v1512_v13 = vpop.eup %1511  ;;  %v701_v14 = vsel %vm41_vm0, %v1510_v11, 0.0 }
 0x17c   :  { %1521 = vpow2.f32 %v696_v12  ;;  %702 = vadd.xlane.f32.xlu1 %v701_v14  ;;  %v704_v15 = vsel %vm41_vm0, %v1512_v13, 0.0 }
 0x17d   :  { %705 = vadd.xlane.f32.xlu0 %v704_v15 }
 0x17e   :  { %v1514_v16 = vpop.eup %1513 }
 0x17f   :  { %v1516_v17 = vpop.eup %1515  ;;  %v707_v18 = vsel %vm41_vm0, %v1514_v16, 0.0 }
 0x180   :  { %708 = vadd.xlane.f32.xlu1 %v707_v18  ;;  %v710_v19 = vsel %vm41_vm0, %v1516_v17, 0.0 }
 0x181   :  { %711 = vadd.xlane.f32.xlu0 %v710_v19 }
 0x182   :  { %v1700_v20 = vpop.eup %1517 }
 0x183   :  { %v1702_v21 = vpop.eup %1519  ;;  %v713_v22 = vsel %vm41_vm0, %v1700_v20, 0.0 }
 0x184   :  { %714 = vadd.xlane.f32.xlu1 %v713_v22  ;;  %v716_v23 = vsel %vm41_vm0, %v1702_v21, 0.0 }
 0x185   :  { %717 = vadd.xlane.f32.xlu0 %v716_v23 }
 0x186   :  { %v1708_v24 = vpop.eup %1521 }
 0x187   :  { %v719_v25 = vsel %vm41_vm0, %v1708_v24, 0.0 }
 0x188   :  { %720 = vadd.xlane.f32.xlu1 %v719_v25 }
 0x205   :  { %v700_v28 = vpop.xlane.xlu0 %699 }
 0x206   :  { %1523 = vrcp.f32 %v700_v28 }
 0x209   :  { %v703_v29 = vpop.xlane.xlu1 %702 }
 0x20a   :  { %1525 = vrcp.f32 %v703_v29  ;;  %v706_v30 = vpop.xlane.xlu0 %705 }
 0x20b   :  { %1527 = vrcp.f32 %v706_v30 }
 0x20d   :  { %v709_v31 = vpop.xlane.xlu1 %708 }
 0x20e   :  { %1529 = vrcp.f32 %v709_v31  ;;  %v712_v32 = vpop.xlane.xlu0 %711 }
 0x20f   :  { %1531 = vrcp.f32 %v712_v32 }
 0x210   :  { %v1524_v33 = vpop.eup %1523 }
 0x211   :  { %v723_v34 = vmul.f32 %v1524_v33, %v1508_v5  ;;  %v715_v35 = vpop.xlane.xlu1 %714 }
 0x212   :  { %1533 = vrcp.f32 %v715_v35  ;;  %v718_v37 = vpop.xlane.xlu0 %717 }
 0x213   :  { %1338 = vst.msk [vmem:[#allocation2] sm:$0xff] %vm41_vm0, %v723_v34  ;;  %1535 = vrcp.f32 %v718_v37  ;;  %1465 = vmatmul.mubr.msk.f32.vlgmr.msra.gmra.mrb[8].mxu0 %vm41_vm0, %v723_v34 }
 0x214   :  { %v1526_v38 = vpop.eup %1525  ;;  %1473 = vmatpush3.msra.mxu0 %v740_v36  ;;  %1474 = vmatprep.mubr.msk.f32.mxu0 %vm1564_vm1, %v1563_v3 }
 0x215   :  { %v1528_v39 = vpop.eup %1527  ;;  %v725_v40 = vmul.f32 %v1526_v38, %v1510_v11  ;;  %v721_v41 = vpop.xlane.xlu1 %720  ;;  %1482 = vmatprep.subr.mxu0 %v1563_v3 }
 0x216   :  { %v727_v43 = vmul.f32 %v1528_v39, %v1512_v13  ;;  %1537 = vrcp.f32 %v721_v41 }
 0x217   :  { %1339 = vst.msk [vmem:[#allocation2 + $0x8] sm:$0xff] %vm41_vm0, %v725_v40  ;;  %1470 = vmatmul.mubr.msk.f32.vlgmr.msra.gmra.mrb[8].mxu1 %vm41_vm0, %v725_v40 }
 0x218   :  { %v1530_v45 = vpop.eup %1529  ;;  %1340 = vst.msk [vmem:[#allocation2 + $0x10] sm:$0xff] %vm41_vm0, %v727_v43  ;;  %1475 = vmatmul.mubr.msk.f32.vlgmr.msra.gmra.mrb[10].mxu0 %vm41_vm0, %v727_v43  ;;  %1478 = vmatpush3.msra.mxu1 %v741_v42 }
 0x219   :  { %v1532_v46 = vpop.eup %1531  ;;  %v729_v47 = vmul.f32 %v1530_v45, %v1514_v16  ;;  %1479 = vmatprep.mubr.msk.f32.mxu1 %vm1564_vm1, %v1563_v3  ;;  %1483 = vmatpush3.msra.mxu0 %v742_v44 }
 0x21a   :  { %v731_v49 = vmul.f32 %v1532_v46, %v1516_v17  ;;  %1484 = vmatprep.mubr.msk.f32.mxu0 %vm1564_vm1, %v1563_v3  ;;  %1487 = vmatprep.subr.mxu1 %v1563_v3 }
 0x21b   :  { %1341 = vst.msk [vmem:[#allocation2 + $0x18] sm:$0xff] %vm41_vm0, %v729_v47  ;;  %1480 = vmatmul.mubr.msk.f32.vlgmr.msra.gmra.mrb[10].mxu1 %vm41_vm0, %v729_v47  ;;  %1492 = vmatprep.subr.mxu0 %v1563_v3 }
 0x21c   :  { %v1534_v51 = vpop.eup %1533  ;;  %1342 = vst.msk [vmem:[#allocation2 + $0x20] sm:$0xff] %vm41_vm0, %v731_v49  ;;  %1485 = vmatmul.mubr.msk.f32.vlgmr.msra.gmra.mrb[12].mxu0 %vm41_vm0, %v731_v49  ;;  %1488 = vmatpush3.msra.mxu1 %v743_v48 }
 0x21d   :  { %v1536_v52 = vpop.eup %1535  ;;  %v733_v53 = vmul.f32 %v1534_v51, %v1700_v20  ;;  %1489 = vmatprep.mubr.msk.f32.mxu1 %vm1564_vm1, %v1563_v3  ;;  %1493 = vmatpush3.msra.mxu0 %v744_v50 }
 0x21e   :  { %v735_v55 = vmul.f32 %v1536_v52, %v1702_v21  ;;  %1494 = vmatprep.mubr.msk.f32.mxu0 %vm1564_vm1, %v1563_v3  ;;  %1497 = vmatprep.subr.mxu1 %v1563_v3 }
 0x21f   :  { %1343 = vst.msk [vmem:[#allocation2 + $0x28] sm:$0xff] %vm41_vm0, %v733_v53  ;;  %1490 = vmatmul.mubr.msk.f32.vlgmr.msra.gmra.mrb[12].mxu1 %vm41_vm0, %v733_v53 }
 0x220   :  { %v1538_v56 = vpop.eup %1537  ;;  %1344 = vst.msk [vmem:[#allocation2 + $0x30] sm:$0xff] %vm41_vm0, %v735_v55  ;;  %1495 = vmatmul.mubr.msk.f32.vlgmr.msra.gmra.mrb[14].mxu0 %vm41_vm0, %v735_v55  ;;  %1498 = vmatpush3.msra.mxu1 %v745_v54 }
 0x221   :  { %v737_v57 = vmul.f32 %v1538_v56, %v1708_v24  ;;  %1499 = vmatprep.mubr.msk.f32.mxu1 %vm1564_vm1, %v1563_v3 }
 0x223   :  { %1345 = vst.msk [vmem:[#allocation2 + $0x38] sm:$0xff] %vm41_vm0, %v737_v57  ;;  %1500 = vmatmul.mubr.msk.f32.vlgmr.msra.gmra.mrb[14].mxu1 %vm41_vm0, %v737_v57 }
 0x224   :  { %1550 = shalt.err (!%p1547_p4)
}
 0x225   :  { %s1551_s13 = scalar_lea.hbm %s1821_s4, 1024 }
 0x226   :  { %p1552_p5 = scmp.ne.s32.totalorder %s1821_s4, %s1551_s13  ;;  %p1555_p6 = scmp.lt.u32.totalorder %s1551_s13, %s1821_s4 }
 0x228   :  { %p1557_p7 = pnand %p1555_p6, %p1552_p5 }
 0x22a   :  { %1560 = shalt.err (!%p1557_p7)
}
 0x22b   :  { %s1566_s18 = smov 128   ;;  %s1567_s19 = smov 8  }
 0x22c   :  { %1359 = dma.vmem_to_hbm [thread:$0]  %s1354_s9, 1024, %s1821_s4, [#allocation3], %s1566_s18, %s1566_s18, %s1567_s19  }
 0x2e6   :  { %v815_v3 = vpop.f32.mrb[8].mxu0 }
 0x2e7   :  { %1330 = vst.msk [vmem:[%s1820_s3] sm:$0xff] %vm41_vm0, %v815_v3  ;;  %v1466_v58 = vpop.f32.mrb[9].mxu0 }
 0x2ea   :  { %v888_v59 = vpop.f32.mrb[8].mxu1 }
 0x2eb   :  { %1331 = vst.msk [vmem:[%s1820_s3 + $0x8] sm:$0xff] %vm41_vm0, %v888_v59  ;;  %v961_v60 = vpop.f32.mrb[10].mxu0  ;;  %v1471_v61 = vpop.f32.mrb[9].mxu1 }
 0x2ec   :  { %1332 = vst.msk [vmem:[%s1820_s3 + $0x10] sm:$0xff] %vm41_vm0, %v961_v60  ;;  %v1476_v62 = vpop.f32.mrb[11].mxu0 }
 0x2ee   :  { %v1034_v63 = vpop.f32.mrb[10].mxu1 }
 0x2ef   :  { %1333 = vst.msk [vmem:[%s1820_s3 + $0x18] sm:$0xff] %vm41_vm0, %v1034_v63  ;;  %v1107_v0 = vpop.f32.mrb[12].mxu0  ;;  %v1481_v1 = vpop.f32.mrb[11].mxu1 }
 0x2f0   :  { %1334 = vst.msk [vmem:[%s1820_s3 + $0x20] sm:$0xff] %vm41_vm0, %v1107_v0  ;;  %v1486_v2 = vpop.f32.mrb[13].mxu0 }
 0x2f2   :  { %v1180_v4 = vpop.f32.mrb[12].mxu1 }
 0x2f3   :  { %1335 = vst.msk [vmem:[%s1820_s3 + $0x28] sm:$0xff] %vm41_vm0, %v1180_v4  ;;  %v1253_v5 = vpop.f32.mrb[14].mxu0  ;;  %v1491_v6 = vpop.f32.mrb[13].mxu1 }
 0x2f4   :  { %1336 = vst.msk [vmem:[%s1820_s3 + $0x30] sm:$0xff] %vm41_vm0, %v1253_v5  ;;  %v1496_v7 = vpop.f32.mrb[15].mxu0 }
 0x2f6   :  { %v1326_v8 = vpop.f32.mrb[14].mxu1 }
 0x2f7   :  { %1337 = vst.msk [vmem:[%s1820_s3 + $0x38] sm:$0xff] %vm41_vm0, %v1326_v8  ;;  %v1501_v9 = vpop.f32.mrb[15].mxu1 }
 0x2f8   :  { %1561 = dma.done.wait [#allocation3], 1024  }
 0x2f9   :  { %1562 = vsyncadd [#allocation3], 4294966272 }
 0x2fa   :  { %1365 = vsyncpa [#allocation3], 1 }

// kernel: encoder_forward.8
= control target key start
LH: loop header
LB: loop body
LE: loop exit
PB: predicated region body
PF: predicated region fallthrough
CT: control target
= control target key end

     0   :  { %vm44_vm0 = vcmask 261120   ;;  %v1554_v20 = vmov 0.0|0.0   ;;  %vm1555_vm1 = vmmov 0   ;;  %v1556_v24 = vmov 0.0   ;;  %s1810_s2 = inlined_call_operand.vmem [shape: f32[32,32], index: 2, kind: input, shape index: {}]   ;;  %s1811_s1 = inlined_call_operand.vmem [shape: f32[16,32], index: 1, kind: input, shape index: {}]   ;;  %s1812_s5 = inlined_call_operand.vmem [shape: f32[32,128], index: 5, kind: input, shape index: {}]   ;;  %s1813_s4 = inlined_call_operand.vmem [shape: f32[32,128], index: 4, kind: input, shape index: {}]   ;;  %s1814_s6 = inlined_call_operand.vmem [shape: f32[32,128], index: 6, kind: input, shape index: {}]   ;;  %s1815_s3 = inlined_call_operand.vmem [shape: f32[1,32], index: 3, kind: input, shape index: {}]   ;;  %s1816_s0 = inlined_call_operand.vmem [shape: f32[16,32], index: 0, kind: input, shape index: {}]   ;;  %s1817_s7 = inlined_call_operand.vmem [shape: f32[1,128], index: 7, kind: input, shape index: {}]   ;;  %s1818_s8 = inlined_call_operand.vmem [shape: f32[16,32], index: 8, kind: output, shape index: {}]  }
   0x1   :  { %v33_v0 = vld [vmem:[%s1810_s2] sm:$0xff]  ;;  %v34_v1 = vld [vmem:[%s1810_s2 + $0x8] sm:$0xff]  ;;  %v35_v2 = vld [vmem:[%s1810_s2 + $0x10] sm:$0xff]  ;;  %vm312_vm2 = vcmask 1040384   ;;  %vm1176_vm3 = vcmask 1041408   ;;  %vm1178_vm4 = vcmask 1042432  }
   0x2   :  { %v1411_v3 = vpack.c.bf16 %v34_v1, %v33_v0  ;;  %v36_v4 = vld [vmem:[%s1810_s2 + $0x18] sm:$0xff]  ;;  %v31_v5 = vld [vmem:[%s1811_s1] sm:$0xff]  ;;  %v131_v8 = vld [vmem:[%s1812_s5 + $0x8] sm:$0xff]  ;;  %vm1180_vm5 = vcmask 1043456   ;;  %vm1182_vm6 = vcmask 1044480   ;;  %vm1184_vm7 = vcmask 1045504  }
   0x3   :  { %v1415_v6 = vpack.c.bf16 %v36_v4, %v35_v2  ;;  %1298 = vmatprep.mubr.msk.f32.mxu0 %vm44_vm0, %v31_v5  ;;  %v130_v7 = vld [vmem:[%s1812_s5] sm:$0xff]  ;;  %v32_v10 = vld [vmem:[%s1811_s1 + $0x8] sm:$0xff]  ;;  %v132_v11 = vld [vmem:[%s1812_s5 + $0x10] sm:$0xff]  ;;  %vm1186_vm8 = vcmask 1046528  }
   0x4   :  { %1412 = vmatprep.subr.bf16.mxu0 %v1411_v3  ;;  %v1419_v9 = vpack.c.bf16 %v131_v8, %v130_v7  ;;  %v133_v12 = vld [vmem:[%s1812_s5 + $0x18] sm:$0xff]  ;;  %v126_v14 = vld [vmem:[%s1813_s4] sm:$0xff]  ;;  %v127_v15 = vld [vmem:[%s1813_s4 + $0x8] sm:$0xff] }
   0x5   :  { %1414 = vmatpush3.bf16.msra.mxu0 %v1411_v3  ;;  %v1423_v13 = vpack.c.bf16 %v133_v12, %v132_v11  ;;  %v1427_v16 = vpack.c.bf16 %v127_v15, %v126_v14  ;;  %v305_v17 = vld [vmem:[%s1814_s6] sm:$0xff]  ;;  %v306_v18 = vld [vmem:[%s1814_s6 + $0x8] sm:$0xff]  ;;  %v307_v21 = vld [vmem:[%s1814_s6 + $0x10] sm:$0xff] }
   0x6   :  { %1416 = vmatprep.subr.bf16.mxu0 %v1415_v6  ;;  %1420 = vmatprep.subr.bf16.mxu1 %v1419_v9  ;;  %v1648_v19 = vpack.c.bf16 %v306_v18, %v305_v17  ;;  %v308_v22 = vld [vmem:[%s1814_s6 + $0x18] sm:$0xff]  ;;  %v1209_v25 = vld [vmem:[%s1815_s3] ss:$0 sm:$0xff]  ;;  %v128_v27 = vld [vmem:[%s1813_s4 + $0x10] sm:$0xff] }
   0x7   :  { %1422 = vmatpush3.bf16.msra.mxu1 %v1419_v9  ;;  %v1659_v23 = vpack.c.bf16 %v308_v22, %v307_v21  ;;  %v129_v28 = vld [vmem:[%s1813_s4 + $0x18] sm:$0xff]  ;;  %v29_v33 = vld [vmem:[%s1816_s0] sm:$0xff]  ;;  %v30_v34 = vld [vmem:[%s1816_s0 + $0x8] sm:$0xff]  ;;  %s1557_s0 = smov 64  }
   0x8   :  { %1424 = vmatprep.subr.bf16.mxu1 %v1423_v13  ;;  %v1431_v32 = vpack.c.bf16 %v129_v28, %v128_v27  ;;  %v1216_v37 = vld [vmem:[%s1817_s7] ss:$0 sm:$0xff]  ;;  %s1558_s7 = smov 32  }
   0x9   :  { %1418 = vmatpush3.bf16.msra.mxu0 %v1415_v6 }
   0xa   :  { %1435 = vmatprep.subr.bf16.mxu0 %v1554_v20 }
   0xb   :  { %1426 = vmatpush3.bf16.msra.mxu1 %v1423_v13 }
   0xc   :  { %1299 = vmatmul.mubr.msk.f32.vlgmr.msra.gmra.mrb[0].mxu0 %vm44_vm0, %v32_v10  ;;  %1428 = vmatprep.subr.bf16.mxu1 %v1427_v16 }
   0xd   :  { %1437 = vmatpush3.bf16.msra.mxu0 %v1648_v19  ;;  %1331 = vmatprep.mubr.msk.f32.mxu0 %vm1555_vm1, %v1556_v24 }
   0xe   :  { %1438 = vmatprep.subr.bf16.mxu0 %v1554_v20 }
  0x11   :  { %1440 = vmatpush3.bf16.msra.mxu0 %v1659_v23 }
  0x12   :  { %1441 = vmatprep.subr.bf16.mxu0 %v1554_v20 }
  0x14   :  { %1332 = vmatmul.mubr.f32.vlgmr.msra.gmra.mrb[2].mxu0 %v1556_v24 }
  0x15   :  { %1443 = vmatpush3.bf16.msra.mxu0 %v1648_v19  ;;  %1342 = vmatprep.mubr.msk.f32.mxu0 %vm1555_vm1, %v1556_v24 }
  0x16   :  { %1444 = vmatprep.subr.bf16.mxu0 %v1554_v20 }
  0x19   :  { %1446 = vmatpush3.bf16.msra.mxu0 %v1659_v23 }
  0x1a   :  { %1453 = vmatprep.subr.bf16.mxu0 %v1554_v20 }
  0xdf   :  { %v1300_v26 = vpop.f32.mrb[0].mxu0 }
  0xe0   :  { %v117_v29 = vpop.f32.mrb[1].mxu0  ;;  %v123_v31 = vadd.f32 %v1300_v26, %v1209_v25 }
  0xe1   :  { %v118_v30 = vadd.f32 %v1209_v25, %v117_v29 }
  0xe3   :  { %1309 = vmatprep.mubr.msk.f32.mxu1 %vm44_vm0, %v118_v30 }
  0xe4   :  { %1310 = vmatmul.mubr.msk.f32.vlgmr.msra.gmra.mrb[0].mxu1 %vm44_vm0, %v123_v31 }
  0xe5   :  { %1430 = vmatpush3.bf16.msra.mxu1 %v1427_v16  ;;  %1320 = vmatprep.mubr.msk.f32.mxu1 %vm44_vm0, %v29_v33 }
  0xe6   :  { %1432 = vmatprep.subr.bf16.mxu1 %v1431_v32 }
  0xe7   :  { %v383_v35 = vpop.f32.mrb[2].mxu0 }
  0xe8   :  { %v1333_v36 = vpop.f32.mrb[3].mxu0 }
  0xe9   :  { %1434 = vmatpush3.bf16.msra.mxu1 %v1431_v32 }
  0xea   :  { %1447 = vmatprep.subr.bf16.mxu1 %v1554_v20 }
  0xec   :  { %1321 = vmatmul.mubr.msk.f32.vlgmr.msra.gmra.mrb[0].mxu1 %vm44_vm0, %v30_v34 }
  0xed   :  { %1449 = vmatpush3.bf16.msra.mxu1 %v1648_v19  ;;  %1353 = vmatprep.mubr.msk.f32.mxu1 %vm1555_vm1, %v1556_v24 }
  0xee   :  { %1450 = vmatprep.subr.bf16.mxu1 %v1554_v20 }
  0xf1   :  { %1452 = vmatpush3.bf16.msra.mxu1 %v1659_v23 }
  0xf2   :  { %1459 = vmatprep.subr.bf16.mxu1 %v1554_v20 }
 0x1bf   :  { %v1322_v38 = vpop.f32.mrb[0].mxu1 }
 0x1c0   :  { %v304_v39 = vadd.f32 %v1322_v38, %v1216_v37  ;;  %v287_v40 = vpop.f32.mrb[1].mxu1 }
 0x1c1   :  { %v303_v41 = vadd.f32 %v1216_v37, %v287_v40 }
 0x1c2   :  { %v310_v42 = vrot.slane %v304_v39, 7  ;;  %v518_v43 = vrot.slane %v304_v39, 1  ;;  %v623_v44 = vrot.slane %v304_v39, 2  ;;  %v728_v45 = vrot.slane %v304_v39, 3 }
 0x1c3   :  { %v413_v46 = vrot.slane %v303_v41, 1  ;;  %v516_v47 = vrot.slane %v303_v41, 2  ;;  %v621_v48 = vrot.slane %v303_v41, 3  ;;  %v726_v49 = vrot.slane %v303_v41, 4 }
 0x1c4   :  { %v313_v50 = vsel %vm312_vm2, %v303_v41, %v310_v42  ;;  %v831_v51 = vrot.slane %v303_v41, 5  ;;  %v833_v52 = vrot.slane %v304_v39, 4  ;;  %v936_v53 = vrot.slane %v303_v41, 6 }
 0x1c5   :  { %v387_v54 = vadd.f32 %v383_v35, %v313_v50  ;;  %v415_v55 = vsel %vm312_vm2, %v413_v46, %v304_v39  ;;  %v1704_v56 = vsel %vm312_vm2, %v516_v47, %v518_v43  ;;  %v1707_v57 = vsel %vm312_vm2, %v621_v48, %v623_v44 }
 0x1c6   :  { %v1710_v58 = vsel %vm312_vm2, %v726_v49, %v728_v45  ;;  %v1713_v59 = vsel %vm312_vm2, %v831_v51, %v833_v52  ;;  %v938_v60 = vrot.slane %v304_v39, 5  ;;  %v1041_v61 = vrot.slane %v303_v41, 7 }
 0x1c7   :  { %1490 = vtanh.f32 %v387_v54  ;;  %v1043_v62 = vrot.slane %v304_v39, 6  ;;  %v1217_v2 = vmul.f32 -1.442695, %v387_v54 }
 0x1c8   :  { %v1716_v63 = vsel %vm312_vm2, %v936_v53, %v938_v60 }
 0x1c9   :  { %v1719_v0 = vsel %vm312_vm2, %v1041_v61, %v1043_v62  ;;  %1492 = vpow2.f32 %v1217_v2 }
 0x1d1   :  { %v1491_v1 = vpop.eup %1490 }
 0x1d2   :  { %397 = vrot.lane.b32.xlu0 %v1491_v1, %s1557_s0 }
 0x1d3   :  { %v1493_v3 = vpop.eup %1492 }
 0x1d4   :  { %v391_v4 = vadd.f32 1.0, %v1493_v3 }
 0x1d6   :  { %1494 = vrcp.f32 %v391_v4 }
 0x1e0   :  { %v1495_v5 = vpop.eup %1494 }
 0x1e1   :  { %v395_v8 = vmul.f32 0.0, %v1495_v5 }
 0x244   :  { %v398_v6 = vpop.permute.xlu0 %397 }
 0x245   :  { %v400_v7 = vmul.f32 %v1495_v5, %v398_v6 }
 0x247   :  { %402 = vrot.lane.b32.xlu0 %v400_v7, %s1558_s7 }
 0x2b9   :  { %v403_v9 = vpop.permute.xlu0 %402 }
 0x2ba   :  { %v405_v10 = vadd.f32 %v403_v9, %v395_v8 }
 0x2bc   :  { %1496 = vtanh.f32 %v405_v10 }
 0x2c6   :  { %v1497_v11 = vpop.eup %1496 }
 0x2c7   :  { %408 = vrot.lane.b32.xlu1 %v1497_v11, %s1557_s0 }
 0x339   :  { %v409_v12 = vpop.permute.xlu1 %408 }
 0x33a   :  { %v1724_v13 = vmul.f32 %v1495_v5, %v409_v12 }
 0x33c   :  { %417 = vrot.lane.b32.xlu1 %v1724_v13, %s1558_s7  ;;  %v1161_v53 = vrot.slane %v1724_v13, 1 }
 0x3ae   :  { %v418_v14 = vpop.permute.xlu1 %417 }
 0x3af   :  { %1343 = vmatmul.mubr.msk.f32.vlgmr.msra.gmra.mrb[4].mxu0 %vm44_vm0, %v418_v14 }
 0x3b0   :  { %1455 = vmatpush3.bf16.msra.mxu0 %v1648_v19  ;;  %1364 = vmatprep.mubr.msk.f32.mxu0 %vm1555_vm1, %v1556_v24 }
 0x3b1   :  { %1456 = vmatprep.subr.bf16.mxu0 %v1554_v20 }
 0x3b4   :  { %1458 = vmatpush3.bf16.msra.mxu0 %v1659_v23 }
 0x3b5   :  { %1465 = vmatprep.subr.bf16.mxu0 %v1554_v20 }
 0x482   :  { %v487_v15 = vpop.f32.mrb[4].mxu0 }
 0x483   :  { %v491_v16 = vadd.f32 %v487_v15, %v415_v55  ;;  %v1344_v17 = vpop.f32.mrb[5].mxu0 }
 0x485   :  { %1498 = vtanh.f32 %v491_v16  ;;  %v1219_v21 = vmul.f32 -1.442695, %v491_v16 }
 0x487   :  { %1500 = vpow2.f32 %v1219_v21 }
 0x48f   :  { %v1499_v18 = vpop.eup %1498 }
 0x490   :  { %501 = vrot.lane.b32.xlu0 %v1499_v18, %s1557_s0 }
 0x491   :  { %v1501_v22 = vpop.eup %1500 }
 0x492   :  { %v495_v25 = vadd.f32 1.0, %v1501_v22 }
 0x494   :  { %1502 = vrcp.f32 %v495_v25 }
 0x49e   :  { %v1503_v26 = vpop.eup %1502 }
 0x49f   :  { %v499_v29 = vmul.f32 %v1503_v26, %v405_v10 }
 0x502   :  { %v502_v27 = vpop.permute.xlu0 %501 }
 0x503   :  { %v504_v28 = vmul.f32 %v1503_v26, %v502_v27 }
 0x505   :  { %506 = vrot.lane.b32.xlu1 %v504_v28, %s1558_s7 }
 0x577   :  { %v507_v30 = vpop.permute.xlu1 %506 }
 0x578   :  { %v509_v31 = vadd.f32 %v507_v30, %v499_v29 }
 0x57a   :  { %1504 = vtanh.f32 %v509_v31 }
 0x584   :  { %v1505_v32 = vpop.eup %1504 }
 0x585   :  { %512 = vrot.lane.b32.xlu0 %v1505_v32, %s1557_s0 }
 0x5f7   :  { %v513_v33 = vpop.permute.xlu0 %512 }
 0x5f8   :  { %v515_v34 = vmul.f32 %v1503_v26, %v513_v33 }
 0x5fa   :  { %522 = vrot.lane.b32.xlu1 %v515_v34, %s1558_s7  ;;  %v1146_v50 = vrot.slane %v515_v34, 7  ;;  %v1188_v60 = vsel %vm312_vm2, %v1161_v53, %v515_v34 }
 0x66c   :  { %v523_v35 = vpop.permute.xlu1 %522 }
 0x66d   :  { %1354 = vmatmul.mubr.msk.f32.vlgmr.msra.gmra.mrb[2].mxu1 %vm44_vm0, %v523_v35 }
 0x66e   :  { %1461 = vmatpush3.bf16.msra.mxu1 %v1648_v19  ;;  %1375 = vmatprep.mubr.msk.f32.mxu1 %vm1555_vm1, %v1556_v24 }
 0x66f   :  { %1462 = vmatprep.subr.bf16.mxu1 %v1554_v20 }
 0x672   :  { %1464 = vmatpush3.bf16.msra.mxu1 %v1659_v23 }
 0x673   :  { %1471 = vmatprep.subr.bf16.mxu1 %v1554_v20 }
 0x740   :  { %v592_v36 = vpop.f32.mrb[2].mxu1 }
 0x741   :  { %v596_v37 = vadd.f32 %v592_v36, %v1704_v56  ;;  %v1355_v38 = vpop.f32.mrb[3].mxu1  ;;  %v1175_v56 = vsel %vm312_vm2, %v1724_v13, %v1146_v50 }
 0x743   :  { %1506 = vtanh.f32 %v596_v37  ;;  %v1221_v40 = vmul.f32 -1.442695, %v596_v37 }
 0x745   :  { %1508 = vpow2.f32 %v1221_v40 }
 0x74d   :  { %v1507_v39 = vpop.eup %1506 }
 0x74e   :  { %606 = vrot.lane.b32.xlu0 %v1507_v39, %s1557_s0 }
 0x74f   :  { %v1509_v41 = vpop.eup %1508 }
 0x750   :  { %v600_v42 = vadd.f32 1.0, %v1509_v41 }
 0x752   :  { %1510 = vrcp.f32 %v600_v42 }
 0x75c   :  { %v1511_v43 = vpop.eup %1510 }
 0x75d   :  { %v604_v46 = vmul.f32 %v1511_v43, %v509_v31 }
 0x7c0   :  { %v607_v44 = vpop.permute.xlu0 %606 }
 0x7c1   :  { %v609_v45 = vmul.f32 %v1511_v43, %v607_v44 }
 0x7c3   :  { %611 = vrot.lane.b32.xlu1 %v609_v45, %s1558_s7 }
 0x835   :  { %v612_v47 = vpop.permute.xlu1 %611 }
 0x836   :  { %v614_v48 = vadd.f32 %v612_v47, %v604_v46 }
 0x838   :  { %1512 = vtanh.f32 %v614_v48 }
 0x842   :  { %v1513_v49 = vpop.eup %1512 }
 0x843   :  { %617 = vrot.lane.b32.xlu0 %v1513_v49, %s1557_s0 }
 0x8b5   :  { %v618_v51 = vpop.permute.xlu0 %617 }
 0x8b6   :  { %v620_v52 = vmul.f32 %v1511_v43, %v618_v51 }
 0x8b8   :  { %v1148_v54 = vrot.slane %v620_v52, 6  ;;  %v1163_v55 = vrot.slane %v620_v52, 7  ;;  %627 = vrot.lane.b32.xlu1 %v620_v52, %s1558_s7 }
 0x8ba   :  { %v1177_v61 = vsel %vm1176_vm3, %v1175_v56, %v1148_v54  ;;  %v1189_v62 = vsel %vm1176_vm3, %v1188_v60, %v1163_v55 }
 0x92a   :  { %v628_v1 = vpop.permute.xlu1 %627 }
 0x92b   :  { %1365 = vmatmul.mubr.msk.f32.vlgmr.msra.gmra.mrb[6].mxu0 %vm44_vm0, %v628_v1 }
 0x92c   :  { %1467 = vmatpush3.bf16.msra.mxu0 %v1648_v19  ;;  %1386 = vmatprep.mubr.msk.f32.mxu0 %vm1555_vm1, %v1556_v24 }
 0x92d   :  { %1468 = vmatprep.subr.bf16.mxu0 %v1554_v20 }
 0x930   :  { %1470 = vmatpush3.bf16.msra.mxu0 %v1659_v23 }
 0x931   :  { %1477 = vmatprep.subr.bf16.mxu0 %v1554_v20 }
 0x9fe   :  { %v697_v2 = vpop.f32.mrb[6].mxu0 }
 0x9ff   :  { %v701_v3 = vadd.f32 %v697_v2, %v1707_v57  ;;  %v1366_v4 = vpop.f32.mrb[7].mxu0 }
 0xa01   :  { %1514 = vtanh.f32 %v701_v3  ;;  %v1223_v6 = vmul.f32 -1.442695, %v701_v3 }
 0xa03   :  { %1516 = vpow2.f32 %v1223_v6 }
 0xa0b   :  { %v1515_v5 = vpop.eup %1514 }
 0xa0c   :  { %711 = vrot.lane.b32.xlu0 %v1515_v5, %s1557_s0 }
 0xa0d   :  { %v1517_v7 = vpop.eup %1516 }
 0xa0e   :  { %v705_v8 = vadd.f32 1.0, %v1517_v7 }
 0xa10   :  { %1518 = vrcp.f32 %v705_v8 }
 0xa1a   :  { %v1519_v9 = vpop.eup %1518 }
 0xa1b   :  { %v709_v12 = vmul.f32 %v1519_v9, %v614_v48 }
 0xa7e   :  { %v712_v10 = vpop.permute.xlu0 %711 }
 0xa7f   :  { %v714_v11 = vmul.f32 %v1519_v9, %v712_v10 }
 0xa81   :  { %716 = vrot.lane.b32.xlu1 %v714_v11, %s1558_s7 }
 0xaf3   :  { %v717_v13 = vpop.permute.xlu1 %716 }
 0xaf4   :  { %v719_v14 = vadd.f32 %v717_v13, %v709_v12 }
 0xaf6   :  { %1520 = vtanh.f32 %v719_v14 }
 0xb00   :  { %v1521_v57 = vpop.eup %1520 }
 0xb01   :  { %722 = vrot.lane.b32.xlu0 %v1521_v57, %s1557_s0 }
 0xb73   :  { %v723_v15 = vpop.permute.xlu0 %722 }
 0xb74   :  { %v725_v16 = vmul.f32 %v1519_v9, %v723_v15 }
 0xb76   :  { %v1150_v17 = vrot.slane %v725_v16, 5  ;;  %v1165_v18 = vrot.slane %v725_v16, 6  ;;  %732 = vrot.lane.b32.xlu1 %v725_v16, %s1558_s7 }
 0xb78   :  { %v1179_v21 = vsel %vm1178_vm4, %v1177_v61, %v1150_v17  ;;  %v1190_v22 = vsel %vm1178_vm4, %v1189_v62, %v1165_v18 }
 0xbe8   :  { %v733_v25 = vpop.permute.xlu1 %732 }
 0xbe9   :  { %1376 = vmatmul.mubr.msk.f32.vlgmr.msra.gmra.mrb[4].mxu1 %vm44_vm0, %v733_v25 }
 0xbea   :  { %1473 = vmatpush3.bf16.msra.mxu1 %v1648_v19  ;;  %1397 = vmatprep.mubr.msk.f32.mxu1 %vm1555_vm1, %v1556_v24 }
 0xbeb   :  { %1474 = vmatprep.subr.bf16.mxu1 %v1554_v20 }
 0xbee   :  { %1476 = vmatpush3.bf16.msra.mxu1 %v1659_v23 }
 0xcbc   :  { %v802_v26 = vpop.f32.mrb[4].mxu1 }
 0xcbd   :  { %v806_v27 = vadd.f32 %v802_v26, %v1710_v58  ;;  %v1377_v28 = vpop.f32.mrb[5].mxu1 }
 0xcbf   :  { %1522 = vtanh.f32 %v806_v27  ;;  %v1225_v30 = vmul.f32 -1.442695, %v806_v27 }
 0xcc1   :  { %1524 = vpow2.f32 %v1225_v30 }
 0xcc9   :  { %v1523_v29 = vpop.eup %1522 }
 0xcca   :  { %816 = vrot.lane.b32.xlu0 %v1523_v29, %s1557_s0 }
 0xccb   :  { %v1525_v31 = vpop.eup %1524 }
 0xccc   :  { %v810_v32 = vadd.f32 1.0, %v1525_v31 }
 0xcce   :  { %1526 = vrcp.f32 %v810_v32 }
 0xcd8   :  { %v1527_v33 = vpop.eup %1526 }
 0xcd9   :  { %v814_v36 = vmul.f32 %v1527_v33, %v719_v14 }
 0xd3c   :  { %v817_v34 = vpop.permute.xlu0 %816 }
 0xd3d   :  { %v819_v35 = vmul.f32 %v1527_v33, %v817_v34 }
 0xd3f   :  { %821 = vrot.lane.b32.xlu1 %v819_v35, %s1558_s7 }
 0xdb1   :  { %v822_v37 = vpop.permute.xlu1 %821 }
 0xdb2   :  { %v824_v38 = vadd.f32 %v822_v37, %v814_v36 }
 0xdb4   :  { %1528 = vtanh.f32 %v824_v38 }
 0xdbe   :  { %v1529_v58 = vpop.eup %1528 }
 0xdbf   :  { %827 = vrot.lane.b32.xlu0 %v1529_v58, %s1557_s0 }
 0xe31   :  { %v828_v39 = vpop.permute.xlu0 %827 }
 0xe32   :  { %v830_v40 = vmul.f32 %v1527_v33, %v828_v39 }
 0xe34   :  { %v1152_v41 = vrot.slane %v830_v40, 4  ;;  %v1167_v42 = vrot.slane %v830_v40, 5  ;;  %837 = vrot.lane.b32.xlu1 %v830_v40, %s1558_s7 }
 0xe36   :  { %v1181_v43 = vsel %vm1180_vm5, %v1179_v21, %v1152_v41  ;;  %v1191_v44 = vsel %vm1180_vm5, %v1190_v22, %v1167_v42 }
 0xea6   :  { %v838_v45 = vpop.permute.xlu1 %837 }
 0xea7   :  { %1387 = vmatmul.mubr.msk.f32.vlgmr.msra.gmra.mrb[8].mxu0 %vm44_vm0, %v838_v45 }
 0xea8   :  { %1479 = vmatpush3.bf16.msra.mxu0 %v1648_v19  ;;  %1408 = vmatprep.mubr.msk.f32.mxu0 %vm1555_vm1, %v1556_v24 }
 0xea9   :  { %1480 = vmatprep.subr.bf16.mxu0 %v1554_v20 }
 0xeac   :  { %1482 = vmatpush3.bf16.msra.mxu0 %v1659_v23 }
 0xf7a   :  { %v907_v46 = vpop.f32.mrb[8].mxu0 }
 0xf7b   :  { %v911_v47 = vadd.f32 %v907_v46, %v1713_v59  ;;  %v1388_v48 = vpop.f32.mrb[9].mxu0 }
 0xf7d   :  { %1530 = vtanh.f32 %v911_v47  ;;  %v1227_v50 = vmul.f32 -1.442695, %v911_v47 }
 0xf7f   :  { %1532 = vpow2.f32 %v1227_v50 }
 0xf87   :  { %v1531_v49 = vpop.eup %1530 }
 0xf88   :  { %921 = vrot.lane.b32.xlu0 %v1531_v49, %s1557_s0 }
 0xf89   :  { %v1533_v51 = vpop.eup %1532 }
 0xf8a   :  { %v915_v52 = vadd.f32 1.0, %v1533_v51 }
 0xf8c   :  { %1534 = vrcp.f32 %v915_v52 }
 0xf96   :  { %v1535_v19 = vpop.eup %1534 }
 0xf97   :  { %v919_v20 = vmul.f32 %v1535_v19, %v824_v38 }
 0xffa   :  { %v922_v53 = vpop.permute.xlu0 %921 }
 0xffb   :  { %v924_v24 = vmul.f32 %v1535_v19, %v922_v53 }
 0xffd   :  { %926 = vrot.lane.b32.xlu1 %v924_v24, %s1558_s7 }
0x106f   :  { %v927_v23 = vpop.permute.xlu1 %926 }
0x1070   :  { %v929_v54 = vadd.f32 %v927_v23, %v919_v20 }
0x1072   :  { %1536 = vtanh.f32 %v929_v54 }
0x107c   :  { %v1537_v59 = vpop.eup %1536 }
0x107d   :  { %932 = vrot.lane.b32.xlu0 %v1537_v59, %s1557_s0 }
0x10ef   :  { %v933_v55 = vpop.permute.xlu0 %932 }
0x10f0   :  { %v935_v56 = vmul.f32 %v1535_v19, %v933_v55 }
0x10f2   :  { %v1154_v60 = vrot.slane %v935_v56, 3  ;;  %v1169_v61 = vrot.slane %v935_v56, 4  ;;  %942 = vrot.lane.b32.xlu1 %v935_v56, %s1558_s7 }
0x10f4   :  { %v1183_v62 = vsel %vm1182_vm6, %v1181_v43, %v1154_v60  ;;  %v1192_v1 = vsel %vm1182_vm6, %v1191_v44, %v1169_v61 }
0x1164   :  { %v943_v2 = vpop.permute.xlu1 %942 }
0x1165   :  { %1398 = vmatmul.mubr.msk.f32.vlgmr.msra.gmra.mrb[6].mxu1 %vm44_vm0, %v943_v2 }
0x1238   :  { %v1012_v3 = vpop.f32.mrb[6].mxu1 }
0x1239   :  { %v1016_v4 = vadd.f32 %v1012_v3, %v1716_v63  ;;  %v1399_v5 = vpop.f32.mrb[7].mxu1 }
0x123b   :  { %1538 = vtanh.f32 %v1016_v4  ;;  %v1229_v7 = vmul.f32 -1.442695, %v1016_v4 }
0x123d   :  { %1540 = vpow2.f32 %v1229_v7 }
0x1245   :  { %v1539_v6 = vpop.eup %1538 }
0x1246   :  { %1026 = vrot.lane.b32.xlu0 %v1539_v6, %s1557_s0 }
0x1247   :  { %v1541_v8 = vpop.eup %1540 }
0x1248   :  { %v1020_v9 = vadd.f32 1.0, %v1541_v8 }
0x124a   :  { %1542 = vrcp.f32 %v1020_v9 }
0x1254   :  { %v1543_v10 = vpop.eup %1542 }
0x1255   :  { %v1024_v13 = vmul.f32 %v1543_v10, %v929_v54 }
0x12b8   :  { %v1027_v11 = vpop.permute.xlu0 %1026 }
0x12b9   :  { %v1029_v12 = vmul.f32 %v1543_v10, %v1027_v11 }
0x12bb   :  { %1031 = vrot.lane.b32.xlu1 %v1029_v12, %s1558_s7 }
0x132d   :  { %v1032_v14 = vpop.permute.xlu1 %1031 }
0x132e   :  { %v1034_v57 = vadd.f32 %v1032_v14, %v1024_v13 }
0x1330   :  { %1544 = vtanh.f32 %v1034_v57 }
0x133a   :  { %v1545_v63 = vpop.eup %1544 }
0x133b   :  { %1037 = vrot.lane.b32.xlu0 %v1545_v63, %s1557_s0 }
0x13ad   :  { %v1038_v15 = vpop.permute.xlu0 %1037 }
0x13ae   :  { %v1040_v16 = vmul.f32 %v1543_v10, %v1038_v15 }
0x13b0   :  { %v1156_v17 = vrot.slane %v1040_v16, 2  ;;  %v1171_v18 = vrot.slane %v1040_v16, 3  ;;  %1047 = vrot.lane.b32.xlu1 %v1040_v16, %s1558_s7 }
0x13b2   :  { %v1185_v21 = vsel %vm1184_vm7, %v1183_v62, %v1156_v17  ;;  %v1193_v22 = vsel %vm1184_vm7, %v1192_v1, %v1171_v18 }
0x1422   :  { %v1048_v25 = vpop.permute.xlu1 %1047 }
0x1423   :  { %1409 = vmatmul.mubr.msk.f32.vlgmr.msra.gmra.mrb[10].mxu0 %vm44_vm0, %v1048_v25 }
0x14f6   :  { %v1117_v26 = vpop.f32.mrb[10].mxu0 }
0x14f7   :  { %v1121_v27 = vadd.f32 %v1117_v26, %v1719_v0  ;;  %v1410_v28 = vpop.f32.mrb[11].mxu0 }
0x14f9   :  { %1546 = vtanh.f32 %v1121_v27  ;;  %v1231_v30 = vmul.f32 -1.442695, %v1121_v27 }
0x14fb   :  { %1548 = vpow2.f32 %v1231_v30 }
0x1503   :  { %v1547_v29 = vpop.eup %1546 }
0x1504   :  { %1131 = vrot.lane.b32.xlu0 %v1547_v29, %s1557_s0 }
0x1505   :  { %v1549_v31 = vpop.eup %1548 }
0x1506   :  { %v1125_v32 = vadd.f32 1.0, %v1549_v31 }
0x1508   :  { %1550 = vrcp.f32 %v1125_v32 }
0x1512   :  { %v1551_v33 = vpop.eup %1550 }
0x1513   :  { %v1129_v36 = vmul.f32 %v1551_v33, %v1034_v57 }
0x1576   :  { %v1132_v34 = vpop.permute.xlu0 %1131 }
0x1577   :  { %v1134_v35 = vmul.f32 %v1551_v33, %v1132_v34 }
0x1579   :  { %1136 = vrot.lane.b32.xlu1 %v1134_v35, %s1558_s7 }
0x15eb   :  { %v1137_v37 = vpop.permute.xlu1 %1136 }
0x15ec   :  { %v1139_v38 = vadd.f32 %v1137_v37, %v1129_v36 }
0x15ee   :  { %1552 = vtanh.f32 %v1139_v38 }
0x15f8   :  { %v1553_v0 = vpop.eup %1552 }
0x15f9   :  { %1142 = vrot.lane.b32.xlu0 %v1553_v0, %s1557_s0 }
0x166b   :  { %v1143_v58 = vpop.permute.xlu0 %1142 }
0x166c   :  { %v1145_v39 = vmul.f32 %v1551_v33, %v1143_v58 }
0x166e   :  { %v1159_v40 = vrot.slane %v1145_v39, 1  ;;  %v1173_v41 = vrot.slane %v1145_v39, 2 }
0x1670   :  { %v1187_v42 = vsel %vm1186_vm8, %v1185_v21, %v1159_v40  ;;  %v1194_v43 = vsel %vm1186_vm8, %v1193_v22, %v1173_v41 }
0x1671   :  { %1197 = vrot.lane.b32.xlu1 %v1187_v42, %s1558_s7  ;;  %1199 = vrot.lane.b32.xlu0 %v1194_v43, %s1558_s7 }
0x16e3   :  { %v1198_v44 = vpop.permute.xlu1 %1197  ;;  %v1200_v45 = vpop.permute.xlu0 %1199 }
0x16e4   :  { %1203 = vst.msk [vmem:[%s1818_s8] sm:$0xff] %vm44_vm0, %v1198_v44  ;;  %1204 = vst.msk [vmem:[%s1818_s8 + $0x8] sm:$0xff] %vm44_vm0, %v1200_v45 }

</bundles_post_ra>
